<compile_context>
chip_gen: v6e
topology: v6e:2x2x1
jax: 0.10.0
libtpu: 0.0.40
codegen_flags: <defaults>
</compile_context>

<pallas_src>
import jax
import jax.numpy as jnp
from jax import lax
from jax.experimental import pallas as pl
from jax.experimental.pallas import tpu as pltpu

CHANNELS = 96        # cfg.chanels
SAMPLE_SIZE = 24     # cfg.sample_size (time axis length T)
KH, KW = 5, 3        # conv1 kernel; conv2 kernel is (5, 1)
BN_EPS = 1e-5


def _round_up(n, m):
    return ((n + m - 1) // m) * m


def _choose_block_b(B):
    """Pick (block_b, padded_B).

    ~0.5 MiB of VMEM per blocked batch (f32 h1 scratch + double-buffered
    output block dominate), so block_b up to 16 stays well inside every
    generation's default scoped-VMEM budget while amortizing the ~0.35 us
    fixed overhead per grid step.  For B <= 8 a single grid step is best on
    single-TensorCore chips (v5e/v6e); for larger B keep an even number of
    >= 2 steps so the batch axis shards evenly across v7x's two TensorCores.
    """
    if B <= 8:
        return B, B
    steps = max(2, -(-B // 16))
    if steps % 2:
        steps += 1
    block_b = -(-B // steps)
    return block_b, steps * block_b


def _sensorconv_kernel(x_ref, w1_ref, s1_ref, t1_ref, w2_ref, s2_ref, t2_ref,
                       out_ref, h1_ref):
    BB = x_ref.shape[0]                # batches per grid step
    M = x_ref.shape[1]                 # T * Wp rows per batch
    Kp = x_ref.shape[2]                # 16 (15 taps + 1 zero pad)
    T = out_ref.shape[1]               # 24
    W = out_ref.shape[2]               # valid sensor columns (6)
    Cp = out_ref.shape[3]              # 128 (96 channels + zero pad)
    PAD = (h1_ref.shape[1] - M) // 2   # 2 * Wp  (time-pad rows, aligned)
    WP = PAD // 2                      # Wp

    # Zero only the time-padding bands consumed by conv2; the interior block
    # is fully overwritten below.  Done every step on purpose: gating on
    # program_id(0)==0 is incorrect under v7x megacore (each core has its own
    # scratch and core 1 never executes pid 0).
    h1_ref[:, pl.ds(0, PAD), :] = jnp.zeros((BB, PAD, Cp), jnp.float32)
    h1_ref[:, pl.ds(PAD + M, PAD), :] = jnp.zeros((BB, PAD, Cp), jnp.float32)

    # conv1 (1 -> C, (5,3) kernel, time pad 2) as a single im2col MXU matmul
    # (bf16 x bf16 -> f32) of shape (BB*M, 16) @ (16, Cp), then folded
    # bn1 + relu in f32.
    xm = x_ref[...].reshape(BB * M, Kp)
    acc1 = jnp.dot(xm, w1_ref[...], preferred_element_type=jnp.float32)
    h1 = jnp.maximum(acc1 * s1_ref[...] + t1_ref[...], 0.0)
    h1_ref[:, pl.ds(PAD, M), :] = h1.reshape(BB, M, Cp)

    # conv2 (C -> C, (5,1) kernel, time pad 2) as 5 shifted bf16 matmuls over
    # the flattened (time, sensor) rows with f32 accumulation, then folded
    # bn2 + relu.  Offsets kh*WP are multiples of 8, so every f32 slice is
    # tile-aligned; the accumulation chain stays uninterrupted (MRB-friendly
    # on v7x).
    acc2 = jnp.zeros((BB * M, Cp), jnp.float32)
    for kh in range(KH):
        a = h1_ref[:, pl.ds(kh * WP, M), :].astype(jnp.bfloat16)
        acc2 = acc2 + jnp.dot(a.reshape(BB * M, Cp), w2_ref[kh],
                              preferred_element_type=jnp.float32)
    out = jnp.maximum(acc2 * s2_ref[...] + t2_ref[...], 0.0)

    # (BB*M, Cp) -> (BB, T, Wp, Cp); store only the W valid sensor rows so the
    # padded (garbage) sensor rows never reach HBM.  Lane dim stays 128-dense.
    out_ref[...] = out.reshape(BB, T, M // T, Cp)[:, :, :W, :]


def sensor_conv(x, params, *, block_b=None):
    (w1, b1, g1, be1, m1, v1, w2, b2, g2, be2, m2, v2) = params
    B, T, S = x.shape
    C = w1.shape[0]
    W = S - (KW - 1)                       # valid sensor columns
    Wp = _round_up(W, 8)                   # sublane-aligned sensor axis
    Cp = _round_up(C, 128)                 # lane-dense channel axis
    NTAP = KH * KW                         # 15
    Kp = _round_up(NTAP, 8)                # 16

    if block_b is None:
        block_b, Bp = _choose_block_b(B)
    else:
        Bp = _round_up(B, block_b)

    # Fold conv bias + inference-mode batch norm into per-channel scale/shift
    # (padded with zeros to Cp so padded lanes stay exactly 0 after relu).
    scale1 = g1 / jnp.sqrt(v1 + BN_EPS)
    shift1 = (b1 - m1) * scale1 + be1
    scale2 = g2 / jnp.sqrt(v2 + BN_EPS)
    shift2 = (b2 - m2) * scale2 + be2
    s1 = jnp.pad(scale1, (0, Cp - C))[None, :]
    t1 = jnp.pad(shift1, (0, Cp - C))[None, :]
    s2 = jnp.pad(scale2, (0, Cp - C))[None, :]
    t2 = jnp.pad(shift2, (0, Cp - C))[None, :]

    # conv1 weights (C, 1, 5, 3) -> (16, Cp) bf16; tap row index = kh*3 + kw.
    w1k = jnp.pad(w1.reshape(C, NTAP).T,
                  ((0, Kp - NTAP), (0, Cp - C))).astype(jnp.bfloat16)
    # conv2 weights (Cout, Cin, 5, 1) -> (5, Cin_pad, Cout_pad) bf16.
    w2k = jnp.pad(jnp.transpose(w2[:, :, :, 0], (2, 1, 0)),
                  ((0, 0), (0, Cp - C), (0, Cp - C))).astype(jnp.bfloat16)

    # im2col slab: (Bp, T*Wp, Kp) bf16, rows ordered t-major / w-minor.
    # (Building it in-kernel from the raw input would save ~10% HBM traffic;
    # bf16 storage already halves the slab's cost.)
    x_pad = jnp.pad(x, ((0, 0), (2, 2), (0, 0)))          # (B, T+4, S)
    taps = [x_pad[:, kh:kh + T, kw:kw + W]
            for kh in range(KH) for kw in range(KW)]
    im2col = jnp.stack(taps, axis=-1)                     # (B, T, W, 15)
    im2col = jnp.pad(im2col, ((0, Bp - B), (0, 0),
                              (0, Wp - W), (0, Kp - NTAP)))
    im2col = im2col.reshape(Bp, T * Wp, Kp).astype(jnp.bfloat16)

    M = T * Wp
    out = pl.pallas_call(
        _sensorconv_kernel,
        out_shape=jax.ShapeDtypeStruct((Bp, T, W, Cp), jnp.float32),
        grid_spec=pltpu.PrefetchScalarGridSpec(
            num_scalar_prefetch=0,
            grid=(Bp // block_b,),
            in_specs=[
                pl.BlockSpec((block_b, M, Kp), lambda b: (b, 0, 0)),
                pl.BlockSpec((Kp, Cp), lambda b: (0, 0)),
                pl.BlockSpec((1, Cp), lambda b: (0, 0)),
                pl.BlockSpec((1, Cp), lambda b: (0, 0)),
                pl.BlockSpec((KH, Cp, Cp), lambda b: (0, 0, 0)),
                pl.BlockSpec((1, Cp), lambda b: (0, 0)),
                pl.BlockSpec((1, Cp), lambda b: (0, 0)),
            ],
            out_specs=pl.BlockSpec((block_b, T, W, Cp),
                                   lambda b: (b, 0, 0, 0)),
            scratch_shapes=[pltpu.VMEM((block_b, (T + 4) * Wp, Cp),
                                       jnp.float32)],
        ),
        compiler_params=pltpu.CompilerParams(
            dimension_semantics=("parallel",),
            vmem_limit_bytes=32 * 1024 * 1024),
    )(im2col, w1k, s1, t1, w2k, s2, t2)

    # (Bp, T, W, Cp) -> strip batch / channel padding
    # -> (B, T, C, W) -> (B, T, C*W)   (matches permute(0,2,1,3).reshape)
    out = out[:B, :, :, :C]
    return jnp.transpose(out, (0, 1, 3, 2)).reshape(B, T, C * W)


def sensor_conv_reference(x, params):
    """Pure-JAX reference reproducing the PyTorch forward (eval-mode BN)."""
    (w1, b1, g1, be1, m1, v1, w2, b2, g2, be2, m2, v2) = params
    B = x.shape[0]

    def bn(y, g, be, m, v):
        return ((y - m[None, :, None, None]) /
                jnp.sqrt(v[None, :, None, None] + BN_EPS) *
                g[None, :, None, None] + be[None, :, None, None])

    y = x[:, None, :, :]                                            # (B,1,T,S)
    y = lax.conv_general_dilated(
        y, w1, (1, 1), ((2, 2), (0, 0)),
        dimension_numbers=('NCHW', 'OIHW', 'NCHW'),
        precision=lax.Precision.HIGHEST)
    y = jnp.maximum(bn(y + b1[None, :, None, None], g1, be1, m1, v1), 0.0)
    y = lax.conv_general_dilated(
        y, w2, (1, 1), ((2, 2), (0, 0)),
        dimension_numbers=('NCHW', 'OIHW', 'NCHW'),
        precision=lax.Precision.HIGHEST)
    y = jnp.maximum(bn(y + b2[None, :, None, None], g2, be2, m2, v2), 0.0)
    y = jnp.transpose(y, (0, 2, 1, 3))                              # (B,T,C,W)
    return y.reshape(B, SAMPLE_SIZE, -1)


def make_params(key):
    ks = jax.random.split(key, 12)
    C = CHANNELS
    w1 = 0.1 * jax.random.normal(ks[0], (C, 1, KH, KW), jnp.float32)
    b1 = 0.1 * jax.random.normal(ks[1], (C,), jnp.float32)
    g1 = jax.random.uniform(ks[2], (C,), jnp.float32, 0.5, 1.5)
    be1 = 0.1 * jax.random.normal(ks[3], (C,), jnp.float32)
    m1 = 0.1 * jax.random.normal(ks[4], (C,), jnp.float32)
    v1 = jax.random.uniform(ks[5], (C,), jnp.float32, 0.5, 1.5)
    w2 = 0.1 * jax.random.normal(ks[6], (C, C, KH, 1), jnp.float32)
    b2 = 0.1 * jax.random.normal(ks[7], (C,), jnp.float32)
    g2 = jax.random.uniform(ks[8], (C,), jnp.float32, 0.5, 1.5)
    be2 = 0.1 * jax.random.normal(ks[9], (C,), jnp.float32)
    m2 = 0.1 * jax.random.normal(ks[10], (C,), jnp.float32)
    v2 = jax.random.uniform(ks[11], (C,), jnp.float32, 0.5, 1.5)
    return (w1, b1, g1, be1, m1, v1, w2, b2, g2, be2, m2, v2)


if __name__ == "__main__":
    key = jax.random.PRNGKey(0)
    kx, kp = jax.random.split(key)
    B, T, S = 2, SAMPLE_SIZE, 8          # x: (batch, time=24, sensors=8)
    x = jax.random.normal(kx, (B, T, S), jnp.float32)
    params = make_params(kp)

    out = jax.block_until_ready(sensor_conv(x, params))
    ref = jax.block_until_ready(sensor_conv_reference(x, params))

    assert out.shape == (B, SAMPLE_SIZE, CHANNELS * (S - 2)), out.shape
    max_err = float(jnp.max(jnp.abs(out - ref)))
    # bf16 matmuls (f32 accumulation) vs f32/HIGHEST reference: tolerance
    # relaxed accordingly; observed error is typically well below 1e-2.
    assert jnp.allclose(out, ref, atol=5e-2, rtol=5e-2), max_err
    print("KERNEL_OK")
</pallas_src>

<mosaic_0001>
module attributes {stable_mosaic.version = 11 : i64} {
  func.func @_sensorconv_kernel(%arg0: i32, %arg1: memref<2x192x16xbf16, #tpu.memory_space<vmem>>, %arg2: memref<16x128xbf16, #tpu.memory_space<vmem>>, %arg3: memref<1x128xf32, #tpu.memory_space<vmem>>, %arg4: memref<1x128xf32, #tpu.memory_space<vmem>>, %arg5: memref<5x128x128xbf16, #tpu.memory_space<vmem>>, %arg6: memref<1x128xf32, #tpu.memory_space<vmem>>, %arg7: memref<1x128xf32, #tpu.memory_space<vmem>>, %arg8: memref<2x24x6x128xf32, #tpu.memory_space<vmem>>, %arg9: memref<2x224x128xf32, #tpu.memory_space<vmem>>) attributes {dimension_semantics = [#tpu.dimension_semantics<parallel>], iteration_bounds = array<i64: 1>, scalar_prefetch = 0 : i64, scratch_operands = 1 : i64, tpu.core_type = #tpu.core_type<tc>, window_params = [{transform_indices = @transform_0, window_bounds = array<i64: 2, 192, 16>}, {pipeline_mode = #tpu.pipeline_mode<synchronous>, transform_indices = @transform_1, window_bounds = array<i64: 16, 128>}, {pipeline_mode = #tpu.pipeline_mode<synchronous>, transform_indices = @transform_2, window_bounds = array<i64: 1, 128>}, {pipeline_mode = #tpu.pipeline_mode<synchronous>, transform_indices = @transform_3, window_bounds = array<i64: 1, 128>}, {pipeline_mode = #tpu.pipeline_mode<synchronous>, transform_indices = @transform_4, window_bounds = array<i64: 5, 128, 128>}, {pipeline_mode = #tpu.pipeline_mode<synchronous>, transform_indices = @transform_5, window_bounds = array<i64: 1, 128>}, {pipeline_mode = #tpu.pipeline_mode<synchronous>, transform_indices = @transform_6, window_bounds = array<i64: 1, 128>}, {transform_indices = @transform_7, window_bounds = array<i64: 2, 24, 6, 128>}]} {
    %cst = arith.constant 0.000000e+00 : f32
    %0 = vector.broadcast %cst : f32 to vector<2x16x128xf32>
    %c0 = arith.constant 0 : index
    %c0_0 = arith.constant 0 : index
    %c0_1 = arith.constant 0 : index
    %1 = vector.load %arg9[%c0, %c0_0, %c0_1] : memref<2x224x128xf32, #tpu.memory_space<vmem>>, vector<2x16x128xf32>
    tpu.vector_store %arg9[%c0, %c0_0, %c0_1], %0 {strides = array<i32>} : memref<2x224x128xf32, #tpu.memory_space<vmem>>, vector<2x16x128xf32>,
    %cst_2 = arith.constant 0.000000e+00 : f32
    %2 = vector.broadcast %cst_2 : f32 to vector<2x16x128xf32>
    %c0_3 = arith.constant 0 : index
    %c208 = arith.constant 208 : index
    %c0_4 = arith.constant 0 : index
    %3 = vector.load %arg9[%c0_3, %c208, %c0_4] : memref<2x224x128xf32, #tpu.memory_space<vmem>>, vector<2x16x128xf32>
    tpu.vector_store %arg9[%c0_3, %c208, %c0_4], %2 {strides = array<i32>} : memref<2x224x128xf32, #tpu.memory_space<vmem>>, vector<2x16x128xf32>,
    %c0_5 = arith.constant 0 : index
    %c0_6 = arith.constant 0 : index
    %c0_7 = arith.constant 0 : index
    %4 = vector.load %arg1[%c0_5, %c0_6, %c0_7] : memref<2x192x16xbf16, #tpu.memory_space<vmem>>, vector<2x192x16xbf16>
    %5 = vector.shape_cast %4 : vector<2x192x16xbf16> to vector<384x16xbf16>
    %c0_8 = arith.constant 0 : index
    %c0_9 = arith.constant 0 : index
    %6 = vector.load %arg2[%c0_8, %c0_9] : memref<16x128xbf16, #tpu.memory_space<vmem>>, vector<16x128xbf16>
    %cst_10 = arith.constant dense<0.000000e+00> : vector<384x128xf32>
    %7 = tpu.matmul %5, %6, %cst_10 {dimension_numbers = #tpu.dot_dimension_numbers<[1], [0], [0], [1], [0, 0, 1, 1], [], []>} : vector<384x16xbf16>, vector<16x128xbf16>, vector<384x128xf32> -> vector<384x128xf32>
    %c0_11 = arith.constant 0 : index
    %c0_12 = arith.constant 0 : index
    %8 = vector.load %arg3[%c0_11, %c0_12] : memref<1x128xf32, #tpu.memory_space<vmem>>, vector<1x128xf32>
    %9 = vector.broadcast %8 : vector<1x128xf32> to vector<384x128xf32>
    %10 = arith.mulf %7, %9 : vector<384x128xf32>
    %c0_13 = arith.constant 0 : index
    %c0_14 = arith.constant 0 : index
    %11 = vector.load %arg4[%c0_13, %c0_14] : memref<1x128xf32, #tpu.memory_space<vmem>>, vector<1x128xf32>
    %12 = vector.broadcast %11 : vector<1x128xf32> to vector<384x128xf32>
    %13 = arith.addf %10, %12 : vector<384x128xf32>
    %cst_15 = arith.constant 0.000000e+00 : f32
    %14 = vector.broadcast %cst_15 : f32 to vector<384x128xf32>
    %15 = arith.maximumf %13, %14 : vector<384x128xf32>
    %16 = vector.shape_cast %15 : vector<384x128xf32> to vector<2x192x128xf32>
    %c0_16 = arith.constant 0 : index
    %c16 = arith.constant 16 : index
    %c0_17 = arith.constant 0 : index
    %17 = vector.load %arg9[%c0_16, %c16, %c0_17] : memref<2x224x128xf32, #tpu.memory_space<vmem>>, vector<2x192x128xf32>
    tpu.vector_store %arg9[%c0_16, %c16, %c0_17], %16 {strides = array<i32>} : memref<2x224x128xf32, #tpu.memory_space<vmem>>, vector<2x192x128xf32>,
    %cst_18 = arith.constant 0.000000e+00 : f32
    %18 = vector.broadcast %cst_18 : f32 to vector<384x128xf32>
    %c0_19 = arith.constant 0 : index
    %c0_20 = arith.constant 0 : index
    %c0_21 = arith.constant 0 : index
    %19 = vector.load %arg9[%c0_19, %c0_20, %c0_21] : memref<2x224x128xf32, #tpu.memory_space<vmem>>, vector<2x192x128xf32>
    %20 = arith.truncf %19 : vector<2x192x128xf32> to vector<2x192x128xbf16>
    %21 = vector.shape_cast %20 : vector<2x192x128xbf16> to vector<384x128xbf16>
    %c0_22 = arith.constant 0 : index
    %c0_23 = arith.constant 0 : index
    %c0_24 = arith.constant 0 : index
    %22 = vector.load %arg5[%c0_22, %c0_23, %c0_24] : memref<5x128x128xbf16, #tpu.memory_space<vmem>>, vector<1x128x128xbf16>
    %23 = vector.shape_cast %22 : vector<1x128x128xbf16> to vector<128x128xbf16>
    %cst_25 = arith.constant dense<0.000000e+00> : vector<384x128xf32>
    %24 = tpu.matmul %21, %23, %cst_25 {dimension_numbers = #tpu.dot_dimension_numbers<[1], [0], [0], [1], [0, 0, 1, 1], [], []>} : vector<384x128xbf16>, vector<128x128xbf16>, vector<384x128xf32> -> vector<384x128xf32>
    %25 = arith.addf %18, %24 : vector<384x128xf32>
    %c0_26 = arith.constant 0 : index
    %c8 = arith.constant 8 : index
    %c0_27 = arith.constant 0 : index
    %26 = vector.load %arg9[%c0_26, %c8, %c0_27] : memref<2x224x128xf32, #tpu.memory_space<vmem>>, vector<2x192x128xf32>
    %27 = arith.truncf %26 : vector<2x192x128xf32> to vector<2x192x128xbf16>
    %28 = vector.shape_cast %27 : vector<2x192x128xbf16> to vector<384x128xbf16>
    %c1 = arith.constant 1 : index
    %c0_28 = arith.constant 0 : index
    %c0_29 = arith.constant 0 : index
    %29 = vector.load %arg5[%c1, %c0_28, %c0_29] : memref<5x128x128xbf16, #tpu.memory_space<vmem>>, vector<1x128x128xbf16>
    %30 = vector.shape_cast %29 : vector<1x128x128xbf16> to vector<128x128xbf16>
    %cst_30 = arith.constant dense<0.000000e+00> : vector<384x128xf32>
    %31 = tpu.matmul %28, %30, %cst_30 {dimension_numbers = #tpu.dot_dimension_numbers<[1], [0], [0], [1], [0, 0, 1, 1], [], []>} : vector<384x128xbf16>, vector<128x128xbf16>, vector<384x128xf32> -> vector<384x128xf32>
    %32 = arith.addf %25, %31 : vector<384x128xf32>
    %c0_31 = arith.constant 0 : index
    %c16_32 = arith.constant 16 : index
    %c0_33 = arith.constant 0 : index
    %33 = vector.load %arg9[%c0_31, %c16_32, %c0_33] : memref<2x224x128xf32, #tpu.memory_space<vmem>>, vector<2x192x128xf32>
    %34 = arith.truncf %33 : vector<2x192x128xf32> to vector<2x192x128xbf16>
    %35 = vector.shape_cast %34 : vector<2x192x128xbf16> to vector<384x128xbf16>
    %c2 = arith.constant 2 : index
    %c0_34 = arith.constant 0 : index
    %c0_35 = arith.constant 0 : index
    %36 = vector.load %arg5[%c2, %c0_34, %c0_35] : memref<5x128x128xbf16, #tpu.memory_space<vmem>>, vector<1x128x128xbf16>
    %37 = vector.shape_cast %36 : vector<1x128x128xbf16> to vector<128x128xbf16>
    %cst_36 = arith.constant dense<0.000000e+00> : vector<384x128xf32>
    %38 = tpu.matmul %35, %37, %cst_36 {dimension_numbers = #tpu.dot_dimension_numbers<[1], [0], [0], [1], [0, 0, 1, 1], [], []>} : vector<384x128xbf16>, vector<128x128xbf16>, vector<384x128xf32> -> vector<384x128xf32>
    %39 = arith.addf %32, %38 : vector<384x128xf32>
    %c0_37 = arith.constant 0 : index
    %c24 = arith.constant 24 : index
    %c0_38 = arith.constant 0 : index
    %40 = vector.load %arg9[%c0_37, %c24, %c0_38] : memref<2x224x128xf32, #tpu.memory_space<vmem>>, vector<2x192x128xf32>
    %41 = arith.truncf %40 : vector<2x192x128xf32> to vector<2x192x128xbf16>
    %42 = vector.shape_cast %41 : vector<2x192x128xbf16> to vector<384x128xbf16>
    %c3 = arith.constant 3 : index
    %c0_39 = arith.constant 0 : index
    %c0_40 = arith.constant 0 : index
    %43 = vector.load %arg5[%c3, %c0_39, %c0_40] : memref<5x128x128xbf16, #tpu.memory_space<vmem>>, vector<1x128x128xbf16>
    %44 = vector.shape_cast %43 : vector<1x128x128xbf16> to vector<128x128xbf16>
    %cst_41 = arith.constant dense<0.000000e+00> : vector<384x128xf32>
    %45 = tpu.matmul %42, %44, %cst_41 {dimension_numbers = #tpu.dot_dimension_numbers<[1], [0], [0], [1], [0, 0, 1, 1], [], []>} : vector<384x128xbf16>, vector<128x128xbf16>, vector<384x128xf32> -> vector<384x128xf32>
    %46 = arith.addf %39, %45 : vector<384x128xf32>
    %c0_42 = arith.constant 0 : index
    %c32 = arith.constant 32 : index
    %c0_43 = arith.constant 0 : index
    %47 = vector.load %arg9[%c0_42, %c32, %c0_43] : memref<2x224x128xf32, #tpu.memory_space<vmem>>, vector<2x192x128xf32>
    %48 = arith.truncf %47 : vector<2x192x128xf32> to vector<2x192x128xbf16>
    %49 = vector.shape_cast %48 : vector<2x192x128xbf16> to vector<384x128xbf16>
    %c4 = arith.constant 4 : index
    %c0_44 = arith.constant 0 : index
    %c0_45 = arith.constant 0 : index
    %50 = vector.load %arg5[%c4, %c0_44, %c0_45] : memref<5x128x128xbf16, #tpu.memory_space<vmem>>, vector<1x128x128xbf16>
    %51 = vector.shape_cast %50 : vector<1x128x128xbf16> to vector<128x128xbf16>
    %cst_46 = arith.constant dense<0.000000e+00> : vector<384x128xf32>
    %52 = tpu.matmul %49, %51, %cst_46 {dimension_numbers = #tpu.dot_dimension_numbers<[1], [0], [0], [1], [0, 0, 1, 1], [], []>} : vector<384x128xbf16>, vector<128x128xbf16>, vector<384x128xf32> -> vector<384x128xf32>
    %53 = arith.addf %46, %52 : vector<384x128xf32>
    %c0_47 = arith.constant 0 : index
    %c0_48 = arith.constant 0 : index
    %54 = vector.load %arg6[%c0_47, %c0_48] : memref<1x128xf32, #tpu.memory_space<vmem>>, vector<1x128xf32>
    %55 = vector.broadcast %54 : vector<1x128xf32> to vector<384x128xf32>
    %56 = arith.mulf %53, %55 : vector<384x128xf32>
    %c0_49 = arith.constant 0 : index
    %c0_50 = arith.constant 0 : index
    %57 = vector.load %arg7[%c0_49, %c0_50] : memref<1x128xf32, #tpu.memory_space<vmem>>, vector<1x128xf32>
    %58 = vector.broadcast %57 : vector<1x128xf32> to vector<384x128xf32>
    %59 = arith.addf %56, %58 : vector<384x128xf32>
    %cst_51 = arith.constant 0.000000e+00 : f32
    %60 = vector.broadcast %cst_51 : f32 to vector<384x128xf32>
    %61 = arith.maximumf %59, %60 : vector<384x128xf32>
    %62 = vector.shape_cast %61 : vector<384x128xf32> to vector<2x24x8x128xf32>
    %63 = vector.extract_strided_slice %62 {offsets = [0, 0, 0, 0], sizes = [2, 24, 6, 128], strides = [1, 1, 1, 1]} : vector<2x24x8x128xf32> to vector<2x24x6x128xf32>
    %c0_52 = arith.constant 0 : index
    %c0_53 = arith.constant 0 : index
    %c0_54 = arith.constant 0 : index
    %c0_55 = arith.constant 0 : index
    %64 = vector.load %arg8[%c0_52, %c0_53, %c0_54, %c0_55] : memref<2x24x6x128xf32, #tpu.memory_space<vmem>>, vector<2x24x6x128xf32>
    tpu.vector_store %arg8[%c0_52, %c0_53, %c0_54, %c0_55], %63 {strides = array<i32>} : memref<2x24x6x128xf32, #tpu.memory_space<vmem>>, vector<2x24x6x128xf32>,
    return
  }
  func.func @transform_0(%arg0: i32) -> (i32, i32, i32) {
    %c0_i32 = arith.constant 0 : i32
    %c0_i32_0 = arith.constant 0 : i32
    %c0_i32_1 = arith.constant 0 : i32
    return %arg0, %c0_i32, %c0_i32_0 : i32, i32, i32
  }
  func.func @transform_1(%arg0: i32) -> (i32, i32) {
    %c0_i32 = arith.constant 0 : i32
    %c0_i32_0 = arith.constant 0 : i32
    %c0_i32_1 = arith.constant 0 : i32
    return %c0_i32, %c0_i32_0 : i32, i32
  }
  func.func @transform_2(%arg0: i32) -> (i32, i32) {
    %c0_i32 = arith.constant 0 : i32
    %c0_i32_0 = arith.constant 0 : i32
    %c0_i32_1 = arith.constant 0 : i32
    return %c0_i32, %c0_i32_0 : i32, i32
  }
  func.func @transform_3(%arg0: i32) -> (i32, i32) {
    %c0_i32 = arith.constant 0 : i32
    %c0_i32_0 = arith.constant 0 : i32
    %c0_i32_1 = arith.constant 0 : i32
    return %c0_i32, %c0_i32_0 : i32, i32
  }
  func.func @transform_4(%arg0: i32) -> (i32, i32, i32) {
    %c0_i32 = arith.constant 0 : i32
    %c0_i32_0 = arith.constant 0 : i32
    %c0_i32_1 = arith.constant 0 : i32
    %c0_i32_2 = arith.constant 0 : i32
    return %c0_i32, %c0_i32_0, %c0_i32_1 : i32, i32, i32
  }
  func.func @transform_5(%arg0: i32) -> (i32, i32) {
    %c0_i32 = arith.constant 0 : i32
    %c0_i32_0 = arith.constant 0 : i32
    %c0_i32_1 = arith.constant 0 : i32
    return %c0_i32, %c0_i32_0 : i32, i32
  }
  func.func @transform_6(%arg0: i32) -> (i32, i32) {
    %c0_i32 = arith.constant 0 : i32
    %c0_i32_0 = arith.constant 0 : i32
    %c0_i32_1 = arith.constant 0 : i32
    return %c0_i32, %c0_i32_0 : i32, i32
  }
  func.func @transform_7(%arg0: i32) -> (i32, i32, i32, i32) {
    %c0_i32 = arith.constant 0 : i32
    %c0_i32_0 = arith.constant 0 : i32
    %c0_i32_1 = arith.constant 0 : i32
    %c0_i32_2 = arith.constant 0 : i32
    return %arg0, %c0_i32, %c0_i32_0, %c0_i32_1 : i32, i32, i32, i32
  }
}

</mosaic_0001>

<bundles_post_ra>
// kernel: tpu_custom_call.1
= control target key start
LH: loop header
LB: loop body
LE: loop exit
PB: predicated region body
PF: predicated region fallthrough
CT: control target
= control target key end

     0   :  { %12 = vsyncpa [#allocation4], 0  ;;  %s3603_s24 = smov [#allocation3]   ;;  %s4626_s0 = inlined_call_operand.vmem [shape: bf16[2,192,16], index: 0, kind: input, shape index: {}]   ;;  %s4627_s1 = inlined_call_operand.vmem [shape: bf16[16,128], index: 1, kind: input, shape index: {}]   ;;  %s4628_s2 = inlined_call_operand.vmem [shape: f32[1,128], index: 2, kind: input, shape index: {}]   ;;  %s4629_s3 = inlined_call_operand.vmem [shape: f32[1,128], index: 3, kind: input, shape index: {}]   ;;  %s4630_s4 = inlined_call_operand.hbm [shape: bf16[5,128,128], index: 4, kind: input, shape index: {}]   ;;  %s4631_s5 = inlined_call_operand.vmem [shape: f32[1,128], index: 5, kind: input, shape index: {}]   ;;  %s4632_s6 = inlined_call_operand.vmem [shape: f32[1,128], index: 6, kind: input, shape index: {}]   ;;  %s4633_s7 = inlined_call_operand.vmem [shape: f32[2,24,6,128], index: 7, kind: output, shape index: {}]  }
   0x1   :  { %s26_s25 = sshll.u32 %s3603_s24, 4  ;;  %s27_s25 = int_to_ptr.vmem [resolvable:$true] %s26_s25 }
   0x2   :  { %s3589_s26 = scalar_lea.vmem %s27_s25, 5120  ;;  %p3594_p1 = scmp.lt.s32.totalorder %s27_s25, %s27_s25 }
   0x3   :  { %p3590_p0 = scmp.ne.s32.totalorder %s27_s25, %s3589_s26  ;;  %p3595_p2 = scmp.lt.s32.totalorder %s3589_s26, %s3589_s26 }
   0x5   :  { %p3596_p3 = por %p3595_p2, %p3594_p1 }
   0x7   :  { %p3597_p4 = pnand %p3596_p3, %p3590_p0 }
   0x9   :  { %3600 = shalt.err (!%p3597_p4)
}
   0xa   :  { %s3604_s27 = smov 64   ;;  %s3605_s28 = smov 4  }
   0xb   :  { %32 = dma.hbm_to_vmem [thread:$0]  %s4630_s4, 5120, %s27_s25, [#allocation4], %s3604_s27, %s3604_s27, %s3605_s28  }
   0xc   :  { %3601 = dma.done.wait [#allocation4], 5120  }
   0xd   :  { %3602 = vsyncadd [#allocation4], 4294962176  ;;  %v3516_v0 = vld [vmem:[%s4627_s1] sm:$0xff]   ;;  %vm225_vm0 = vcmask 130048   ;;  %v3518_v2 = vld [vmem:[%s4626_s0 + $0x8] sm:$0xff]   ;;  %v3606_v42 = vmov 0.0|0.0  }
   0xe   :  { %v3517_v1 = vld [vmem:[%s4626_s0] sm:$0xff]   ;;  %3125 = vmatprep.subr.bf16.mxu0 %v3516_v0  ;;  %v3519_v3 = vld [vmem:[%s4626_s0 + $0x10] sm:$0xff]   ;;  %v3520_v4 = vld [vmem:[%s4626_s0 + $0x18] sm:$0xff]   ;;  %v3607_v60 = vmov 0.0  }
   0xf   :  { %3126 = vmatpush3.bf16.msra.mxu0 %v3516_v0  ;;  %3127 = vmatprep.mubr.msk.bf16.mxu0 %vm225_vm0, %v3517_v1  ;;  %v3521_v5 = vld [vmem:[%s4626_s0 + $0x20] sm:$0xff]   ;;  %v3522_v6 = vld [vmem:[%s4626_s0 + $0x28] sm:$0xff]   ;;  %v3523_v7 = vld [vmem:[%s4626_s0 + $0x30] sm:$0xff]  }
  0x10   :  { %v3524_v8 = vld [vmem:[%s4626_s0 + $0x38] sm:$0xff]   ;;  %v3525_v9 = vld [vmem:[%s4626_s0 + $0x40] sm:$0xff]   ;;  %v3543_v12 = vld [vmem:[#allocation3 + $0x70] sm:$0xff]  }
  0x11   :  { %v3541_v10 = vld [vmem:[#allocation3 + $0x78] sm:$0xff]   ;;  %v3544_v13 = vld [vmem:[#allocation3 + $0x30] sm:$0xff]   ;;  %v3545_v14 = vld [vmem:[#allocation3 + $0x68] sm:$0xff]  }
  0x12   :  { %3128 = vmatmul.mubr.msk.bf16.vlgmr.msra.gmra.mxu0 %vm225_vm0, %v3518_v2  ;;  %v3542_v11 = vld [vmem:[#allocation3 + $0x38] sm:$0xff]   ;;  %3175 = vmatprep.subr.bf16.mxu1 %v3541_v10  ;;  %v3546_v15 = vld [vmem:[#allocation3 + $0x28] sm:$0xff]   ;;  %v3527_v17 = vld [vmem:[%s4626_s0 + $0x50] sm:$0xff]  }
  0x13   :  { %3131 = vmatprep.mubr.msk.bf16.mxu0 %vm225_vm0, %v3519_v3  ;;  %3176 = vmatpush3.bf16.msra.mxu1 %v3541_v10  ;;  %v3526_v16 = vld [vmem:[%s4626_s0 + $0x48] sm:$0xff]   ;;  %v3547_v18 = vld [vmem:[#allocation3 + $0x60] sm:$0xff]   ;;  %v3549_v20 = vld [vmem:[#allocation3 + $0x58] sm:$0xff]  }
  0x14   :  { %3239 = vmatprep.subr.bf16.mxu0 %v3542_v11  ;;  %3177 = vmatprep.subr.bf16.mxu1 %v3543_v12  ;;  %v3548_v19 = vld [vmem:[#allocation3 + $0x20] sm:$0xff]   ;;  %v3550_v21 = vld [vmem:[#allocation3 + $0x18] sm:$0xff]   ;;  %v3530_v24 = vld [vmem:[%s4626_s0 + $0x68] sm:$0xff]  }
  0x15   :  { %3240 = vmatpush3.bf16.msra.mxu0 %v3542_v11  ;;  %v3528_v22 = vld [vmem:[%s4626_s0 + $0x58] sm:$0xff]   ;;  %v3529_v23 = vld [vmem:[%s4626_s0 + $0x60] sm:$0xff]   ;;  %v3531_v25 = vld [vmem:[%s4626_s0 + $0x70] sm:$0xff]  }
  0x16   :  { %3241 = vmatprep.subr.bf16.mxu0 %v3544_v13  ;;  %v3532_v26 = vld [vmem:[%s4626_s0 + $0x78] sm:$0xff]   ;;  %v3533_v27 = vld [vmem:[%s4626_s0 + $0x80] sm:$0xff]   ;;  %v3534_v28 = vld [vmem:[%s4626_s0 + $0x88] sm:$0xff]  }
  0x17   :  { %3178 = vmatpush3.bf16.msra.mxu1 %v3543_v12  ;;  %v3535_v29 = vld [vmem:[%s4626_s0 + $0x90] sm:$0xff]   ;;  %v3536_v32 = vld [vmem:[%s4626_s0 + $0x98] sm:$0xff]   ;;  %v3537_v33 = vld [vmem:[%s4626_s0 + $0xa0] sm:$0xff]  }
  0x18   :  { %3179 = vmatprep.subr.bf16.mxu1 %v3545_v14  ;;  %v3551_v30 = vld [vmem:[#allocation3 + $0x50] sm:$0xff]   ;;  %v3553_v34 = vld [vmem:[#allocation3 + $0x48] sm:$0xff]   ;;  %v3555_v36 = vld [vmem:[#allocation3 + $0x40] sm:$0xff]  }
  0x19   :  { %3242 = vmatpush3.bf16.msra.mxu0 %v3544_v13  ;;  %v3552_v31 = vld [vmem:[#allocation3 + $0x10] sm:$0xff]   ;;  %v3554_v35 = vld [vmem:[#allocation3 + $0x8] sm:$0xff]   ;;  %v3556_v37 = vld [vmem:[#allocation3] sm:$0xff]  }
  0x1a   :  { %3132 = vmatmul.mubr.msk.bf16.gmra.mxu0 %vm225_vm0, %v3520_v4  ;;  %3243 = vmatprep.subr.bf16.mxu0 %v3546_v15  ;;  %v3538_v38 = vld [vmem:[%s4626_s0 + $0xa8] sm:$0xff]   ;;  %v3539_v39 = vld [vmem:[%s4626_s0 + $0xb0] sm:$0xff]   ;;  %v3557_v40 = vld [vmem:[#allocation3 + $0xb8] sm:$0xff]  }
  0x1b   :  { %3135 = vmatprep.mubr.msk.bf16.mxu0 %vm225_vm0, %v3521_v5  ;;  %3180 = vmatpush3.bf16.msra.mxu1 %v3545_v14  ;;  %v3540_v41 = vld [vmem:[%s4626_s0 + $0xb8] sm:$0xff]   ;;  %v3754_v45 = vld [vmem:[%s4628_s2] ss:$0 sm:$0xff]  ;;  %v3558_v11 = vld [vmem:[#allocation3 + $0xb0] sm:$0xff]  }
  0x1c   :  { %3181 = vmatprep.subr.bf16.mxu1 %v3547_v18  ;;  %v3563_v43 = vld [vmem:[#allocation3 + $0xf8] sm:$0xff]   ;;  %v3761_v49 = vld [vmem:[%s4629_s3] ss:$0 sm:$0xff]  ;;  %v3564_v12 = vld [vmem:[#allocation3 + $0xf0] sm:$0xff]  }
  0x1d   :  { %3244 = vmatpush3.bf16.msra.mxu0 %v3546_v15 }
  0x1e   :  { %3245 = vmatprep.subr.bf16.mxu0 %v3548_v19 }
  0x1f   :  { %3182 = vmatpush3.bf16.msra.mxu1 %v3547_v18 }
  0x20   :  { %3183 = vmatprep.subr.bf16.mxu1 %v3549_v20 }
  0x21   :  { %3246 = vmatpush3.bf16.msra.mxu0 %v3548_v19 }
  0x22   :  { %3136 = vmatmul.mubr.msk.bf16.gmra.mxu0 %vm225_vm0, %v3522_v6  ;;  %3247 = vmatprep.subr.bf16.mxu0 %v3550_v21 }
  0x23   :  { %3139 = vmatprep.mubr.msk.bf16.mxu0 %vm225_vm0, %v3523_v7  ;;  %3184 = vmatpush3.bf16.msra.mxu1 %v3549_v20 }
  0x24   :  { %3185 = vmatprep.subr.bf16.mxu1 %v3551_v30 }
  0x25   :  { %3248 = vmatpush3.bf16.msra.mxu0 %v3550_v21 }
  0x26   :  { %3249 = vmatprep.subr.bf16.mxu0 %v3552_v31 }
  0x27   :  { %3186 = vmatpush3.bf16.msra.mxu1 %v3551_v30 }
  0x28   :  { %3187 = vmatprep.subr.bf16.mxu1 %v3553_v34 }
  0x29   :  { %3250 = vmatpush3.bf16.msra.mxu0 %v3552_v31 }
  0x2a   :  { %3140 = vmatmul.mubr.msk.bf16.gmra.mxu0 %vm225_vm0, %v3524_v8  ;;  %3251 = vmatprep.subr.bf16.mxu0 %v3554_v35 }
  0x2b   :  { %3143 = vmatprep.mubr.msk.bf16.mxu0 %vm225_vm0, %v3525_v9  ;;  %3188 = vmatpush3.bf16.msra.mxu1 %v3553_v34 }
  0x2c   :  { %3189 = vmatprep.subr.bf16.mxu1 %v3555_v36 }
  0x2d   :  { %3252 = vmatpush3.bf16.msra.mxu0 %v3554_v35  ;;  %v3560_v35 = vld [vmem:[#allocation3 + $0xa0] sm:$0xff]  }
  0x2e   :  { %3253 = vmatprep.subr.bf16.mxu0 %v3556_v37 }
  0x2f   :  { %3190 = vmatpush3.bf16.msra.mxu1 %v3555_v36 }
  0x30   :  { %3303 = vmatprep.subr.bf16.mxu1 %v3557_v40 }
  0x31   :  { %3254 = vmatpush3.bf16.msra.mxu0 %v3556_v37 }
  0x32   :  { %3144 = vmatmul.mubr.msk.bf16.gmra.mxu0 %vm225_vm0, %v3526_v16  ;;  %3367 = vmatprep.subr.bf16.mxu0 %v3563_v43 }
  0x33   :  { %3147 = vmatprep.mubr.msk.bf16.mxu0 %vm225_vm0, %v3527_v17 }
  0x3a   :  { %3148 = vmatmul.mubr.msk.bf16.gmra.mxu0 %vm225_vm0, %v3528_v22  ;;  %v3559_v22 = vld [vmem:[#allocation3 + $0xa8] sm:$0xff]  }
  0x3b   :  { %3151 = vmatprep.mubr.msk.bf16.mxu0 %vm225_vm0, %v3529_v23  ;;  %v3566_v23 = vld [vmem:[#allocation3 + $0xe8] sm:$0xff]  }
  0x42   :  { %3152 = vmatmul.mubr.msk.bf16.gmra.mxu0 %vm225_vm0, %v3530_v24 }
  0x43   :  { %3155 = vmatprep.mubr.msk.bf16.mxu0 %vm225_vm0, %v3531_v25 }
  0x4a   :  { %3156 = vmatmul.mubr.msk.bf16.gmra.mxu0 %vm225_vm0, %v3532_v26 }
  0x4b   :  { %3159 = vmatprep.mubr.msk.bf16.mxu0 %vm225_vm0, %v3533_v27 }
  0x52   :  { %3160 = vmatmul.mubr.msk.bf16.gmra.mxu0 %vm225_vm0, %v3534_v28 }
  0x53   :  { %3163 = vmatprep.mubr.msk.bf16.mxu0 %vm225_vm0, %v3535_v29 }
  0x5a   :  { %3164 = vmatmul.mubr.msk.bf16.gmra.mxu0 %vm225_vm0, %v3536_v32 }
  0x5b   :  { %3167 = vmatprep.mubr.msk.bf16.mxu0 %vm225_vm0, %v3537_v33 }
  0x62   :  { %3168 = vmatmul.mubr.msk.bf16.gmra.mxu0 %vm225_vm0, %v3538_v38 }
  0x63   :  { %3171 = vmatprep.mubr.msk.bf16.mxu0 %vm225_vm0, %v3539_v39 }
  0x6a   :  { %3172 = vmatmul.mubr.msk.bf16.gmra.mxu0 %vm225_vm0, %v3540_v41 }
  0x6b   :  { %3255 = vmatprep.mubr.bf16.mxu0 %v3606_v42 }
  0xd2   :  { %v3129_v44 = vpop.f32.mrf.mxu0 }
  0xd3   :  { %v532_v48 = vmul.f32 %v3129_v44, %v3754_v45 }
  0xd4   :  { %v332_v46 = vpop.f32.mrf.mxu0 }
  0xd5   :  { %v530_v47 = vmul.f32 %v3754_v45, %v332_v46  ;;  %v587_v57 = vadd.f32 %v3761_v49, %v532_v48  ;;  %v3561_v48 = vld [vmem:[#allocation3 + $0x98] sm:$0xff]  }
  0xd6   :  { %v3130_v50 = vpop.f32.mrf.mxu0 }
  0xd7   :  { %v533_v51 = vmul.f32 %v3130_v50, %v3754_v45  ;;  %v585_v52 = vadd.f32 %v3761_v49, %v530_v47  ;;  %v635_v3 = vmax.f32 %v587_v57, 0.0 }
  0xd8   :  { %v335_v53 = vpop.f32.mrf.mxu0 }
  0xd9   :  { %v588_v54 = vadd.f32 %v3761_v49, %v533_v51  ;;  %v531_v55 = vmul.f32 %v3754_v45, %v335_v53  ;;  %v633_v56 = vmax.f32 %v585_v52, 0.0 }
  0xda   :  { %v3133_v58 = vpop.f32.mrf.mxu0 }
  0xdb   :  { %v586_v59 = vadd.f32 %v3761_v49, %v531_v55  ;;  %v819_v61 = vpack.c.bf16 %v633_v56, %v3607_v60  ;;  %v636_v62 = vmax.f32 %v588_v54, 0.0  ;;  %v536_v1 = vmul.f32 %v3133_v58, %v3754_v45  ;;  %v3568_v54 = vld [vmem:[#allocation3 + $0xd8] sm:$0xff]  }
  0xdc   :  { %v348_v63 = vpop.f32.mrf.mxu0 }
  0xdd   :  { %v634_v0 = vmax.f32 %v586_v59, 0.0  ;;  %v534_v2 = vmul.f32 %v3754_v45, %v348_v63  ;;  %3191 = vmatprep.mubr.bf16.mxu1 %v819_v61  ;;  %v3778_v10 = vpack.c.bf16 %v636_v62, %v635_v3  ;;  %v591_v13 = vadd.f32 %v3761_v49, %v536_v1  ;;  %v3562_v63 = vld [vmem:[#allocation3 + $0x90] sm:$0xff]  }
  0xde   :  { %v3134_v4 = vpop.f32.mrf.mxu0 }
  0xdf   :  { %v589_v5 = vadd.f32 %v3761_v49, %v534_v2  ;;  %v3773_v6 = vpack.c.bf16 %v634_v0, %v633_v56  ;;  %v537_v7 = vmul.f32 %v3134_v4, %v3754_v45  ;;  %v3776_v9 = vpack.c.bf16 %v635_v3, %v634_v0  ;;  %v3570_v4 = vld [vmem:[#allocation3 + $0xd0] sm:$0xff]  }
  0xe0   :  { %v351_v8 = vpop.f32.mrf.mxu0  ;;  %v639_v24 = vmax.f32 %v591_v13, 0.0  ;;  %v3565_v13 = vld [vmem:[#allocation3 + $0x88] sm:$0xff]  }
  0xe1   :  { %v637_v14 = vmax.f32 %v589_v5, 0.0  ;;  %v592_v15 = vadd.f32 %v3761_v49, %v537_v7  ;;  %v535_v16 = vmul.f32 %v3754_v45, %v351_v8  ;;  %3256 = vmatmul.mubr.bf16.vlgmr.msra.gmra.mxu0 %v3773_v6  ;;  %3192 = vmatmul.mubr.bf16.vlgmr.msra.gmra.mxu1 %v3776_v9 }
  0xe2   :  { %v3137_v17 = vpop.f32.mrf.mxu0  ;;  %3259 = vmatprep.mubr.bf16.mxu0 %v3778_v10  ;;  %3304 = vmatpush3.bf16.msra.mxu1 %v3557_v40  ;;  %v3567_v40 = vld [vmem:[#allocation3 + $0xe0] sm:$0xff]  }
  0xe3   :  { %v590_v18 = vadd.f32 %v3761_v49, %v535_v16  ;;  %v3787_v19 = vpack.c.bf16 %v637_v14, %v636_v62  ;;  %3368 = vmatpush3.bf16.msra.mxu0 %v3563_v43  ;;  %v540_v20 = vmul.f32 %v3137_v17, %v3754_v45  ;;  %3305 = vmatprep.subr.bf16.mxu1 %v3558_v11  ;;  %v640_v25 = vmax.f32 %v592_v15, 0.0 }
  0xe4   :  { %v364_v21 = vpop.f32.mrf.mxu0  ;;  %3369 = vmatprep.subr.bf16.mxu0 %v3564_v12 }
  0xe5   :  { %v638_v26 = vmax.f32 %v590_v18, 0.0  ;;  %v538_v27 = vmul.f32 %v3754_v45, %v364_v21  ;;  %3195 = vmatprep.mubr.bf16.mxu1 %v3787_v19  ;;  %v595_v32 = vadd.f32 %v3761_v49, %v540_v20  ;;  %v3801_v39 = vpack.c.bf16 %v640_v25, %v639_v24  ;;  %v3571_v18 = vld [vmem:[#allocation3 + $0xc8] sm:$0xff]  }
  0xe6   :  { %v3138_v28 = vpop.f32.mrf.mxu0  ;;  %3306 = vmatpush3.bf16.msra.mxu1 %v3558_v11 }
  0xe7   :  { %v593_v29 = vadd.f32 %v3761_v49, %v538_v27  ;;  %v541_v30 = vmul.f32 %v3138_v28, %v3754_v45  ;;  %v3794_v31 = vpack.c.bf16 %v639_v24, %v638_v26  ;;  %3370 = vmatpush3.bf16.msra.mxu0 %v3564_v12  ;;  %v3797_v34 = vpack.c.bf16 %v638_v26, %v637_v14  ;;  %v3569_v27 = vld [vmem:[#allocation3 + $0x80] sm:$0xff]  }
  0xe8   :  { %v367_v33 = vpop.f32.mrf.mxu0  ;;  %3307 = vmatprep.subr.bf16.mxu1 %v3559_v22  ;;  %3371 = vmatprep.subr.bf16.mxu0 %v3566_v23  ;;  %v643_v50 = vmax.f32 %v595_v32, 0.0 }
  0xe9   :  { %v641_v36 = vmax.f32 %v593_v29, 0.0  ;;  %v596_v37 = vadd.f32 %v3761_v49, %v541_v30  ;;  %v539_v38 = vmul.f32 %v3754_v45, %v367_v33  ;;  %3196 = vmatmul.mubr.bf16.gmra.mxu1 %v3794_v31  ;;  %3260 = vmatmul.mubr.bf16.gmra.mxu0 %v3797_v34  ;;  %v3572_v33 = vld [vmem:[#allocation3 + $0xc0] sm:$0xff]  }
  0xea   :  { %v3141_v41 = vpop.f32.mrf.mxu0  ;;  %3263 = vmatprep.mubr.bf16.mxu0 %v3801_v39  ;;  %3308 = vmatpush3.bf16.msra.mxu1 %v3559_v22 }
  0xeb   :  { %v594_v43 = vadd.f32 %v3761_v49, %v539_v38  ;;  %v3807_v44 = vpack.c.bf16 %v641_v36, %v640_v25  ;;  %v544_v46 = vmul.f32 %v3141_v41, %v3754_v45  ;;  %3309 = vmatprep.subr.bf16.mxu1 %v3560_v35  ;;  %3372 = vmatpush3.bf16.msra.mxu0 %v3566_v23  ;;  %v644_v51 = vmax.f32 %v596_v37, 0.0  ;;  %v3850_v41 = vld [vmem:[#allocation3 + $0x138] sm:$0xff]  }
  0xec   :  { %v380_v47 = vpop.f32.mrf.mxu0  ;;  %3373 = vmatprep.subr.bf16.mxu0 %v3567_v40 }
  0xed   :  { %v642_v52 = vmax.f32 %v594_v43, 0.0  ;;  %v542_v53 = vmul.f32 %v3754_v45, %v380_v47  ;;  %3199 = vmatprep.mubr.bf16.mxu1 %v3807_v44  ;;  %v599_v59 = vadd.f32 %v3761_v49, %v544_v46  ;;  %v3821_v3 = vpack.c.bf16 %v644_v51, %v643_v50 }
  0xee   :  { %v3142_v55 = vpop.f32.mrf.mxu0  ;;  %3310 = vmatpush3.bf16.msra.mxu1 %v3560_v35 }
  0xef   :  { %v597_v56 = vadd.f32 %v3761_v49, %v542_v53  ;;  %v545_v57 = vmul.f32 %v3142_v55, %v3754_v45  ;;  %v3814_v58 = vpack.c.bf16 %v643_v50, %v642_v52  ;;  %v3817_v62 = vpack.c.bf16 %v642_v52, %v641_v36  ;;  %3311 = vmatprep.subr.bf16.mxu1 %v3561_v48 }
  0xf0   :  { %v383_v61 = vpop.f32.mrf.mxu0  ;;  %3374 = vmatpush3.bf16.msra.mxu0 %v3567_v40  ;;  %v647_v14 = vmax.f32 %v599_v59, 0.0 }
  0xf1   :  { %v645_v0 = vmax.f32 %v597_v56, 0.0  ;;  %v600_v1 = vadd.f32 %v3761_v49, %v545_v57  ;;  %v543_v2 = vmul.f32 %v3754_v45, %v383_v61  ;;  %3375 = vmatprep.subr.bf16.mxu0 %v3568_v54  ;;  %3200 = vmatmul.mubr.bf16.gmra.mxu1 %v3814_v58 }
  0xf2   :  { %3264 = vmatmul.mubr.bf16.gmra.mxu0 %v3817_v62  ;;  %v3145_v5 = vpop.f32.mrf.mxu0  ;;  %3312 = vmatpush3.bf16.msra.mxu1 %v3561_v48 }
  0xf3   :  { %v598_v7 = vadd.f32 %v3761_v49, %v543_v2  ;;  %3267 = vmatprep.mubr.bf16.mxu0 %v3821_v3  ;;  %v3827_v8 = vpack.c.bf16 %v645_v0, %v644_v51  ;;  %v548_v11 = vmul.f32 %v3145_v5, %v3754_v45  ;;  %3313 = vmatprep.subr.bf16.mxu1 %v3562_v63  ;;  %v648_v15 = vmax.f32 %v600_v1, 0.0 }
  0xf4   :  { %v396_v12 = vpop.f32.mrf.mxu0  ;;  %3376 = vmatpush3.bf16.msra.mxu0 %v3568_v54 }
  0xf5   :  { %v646_v16 = vmax.f32 %v598_v7, 0.0  ;;  %v546_v17 = vmul.f32 %v3754_v45, %v396_v12  ;;  %3203 = vmatprep.mubr.bf16.mxu1 %v3827_v8  ;;  %3377 = vmatprep.subr.bf16.mxu0 %v3570_v4  ;;  %v603_v24 = vadd.f32 %v3761_v49, %v548_v11  ;;  %v3841_v32 = vpack.c.bf16 %v648_v15, %v647_v14 }
  0xf6   :  { %v3146_v20 = vpop.f32.mrf.mxu0  ;;  %3314 = vmatpush3.bf16.msra.mxu1 %v3562_v63 }
  0xf7   :  { %v601_v21 = vadd.f32 %v3761_v49, %v546_v17  ;;  %v549_v22 = vmul.f32 %v3146_v20, %v3754_v45  ;;  %v3834_v23 = vpack.c.bf16 %v647_v14, %v646_v16  ;;  %v3837_v26 = vpack.c.bf16 %v646_v16, %v645_v0  ;;  %3315 = vmatprep.subr.bf16.mxu1 %v3565_v13 }
  0xf8   :  { %v399_v25 = vpop.f32.mrf.mxu0  ;;  %3378 = vmatpush3.bf16.msra.mxu0 %v3570_v4  ;;  %v651_v43 = vmax.f32 %v603_v24, 0.0 }
  0xf9   :  { %v649_v28 = vmax.f32 %v601_v21, 0.0  ;;  %v604_v29 = vadd.f32 %v3761_v49, %v549_v22  ;;  %v547_v30 = vmul.f32 %v3754_v45, %v399_v25  ;;  %3379 = vmatprep.subr.bf16.mxu0 %v3571_v18  ;;  %3204 = vmatmul.mubr.bf16.gmra.mxu1 %v3834_v23 }
  0xfa   :  { %3268 = vmatmul.mubr.bf16.gmra.mxu0 %v3837_v26  ;;  %v3149_v35 = vpop.f32.mrf.mxu0  ;;  %3316 = vmatpush3.bf16.msra.mxu1 %v3565_v13 }
  0xfb   :  { %v602_v36 = vadd.f32 %v3761_v49, %v547_v30  ;;  %3271 = vmatprep.mubr.bf16.mxu0 %v3841_v32  ;;  %v3847_v37 = vpack.c.bf16 %v649_v28, %v648_v15  ;;  %v552_v38 = vmul.f32 %v3149_v35, %v3754_v45  ;;  %3317 = vmatprep.subr.bf16.mxu1 %v3569_v27  ;;  %v652_v46 = vmax.f32 %v604_v29, 0.0 }
  0xfc   :  { %v412_v40 = vpop.f32.mrf.mxu0  ;;  %3380 = vmatpush3.bf16.msra.mxu0 %v3571_v18 }
  0xfd   :  { %v650_v47 = vmax.f32 %v602_v36, 0.0  ;;  %v550_v48 = vmul.f32 %v3754_v45, %v412_v40  ;;  %3207 = vmatprep.mubr.bf16.mxu1 %v3847_v37  ;;  %3381 = vmatprep.subr.bf16.mxu0 %v3572_v33  ;;  %v607_v54 = vadd.f32 %v3761_v49, %v552_v38  ;;  %v3866_v63 = vpack.c.bf16 %v652_v46, %v651_v43 }
  0xfe   :  { %v3150_v50 = vpop.f32.mrf.mxu0  ;;  %3318 = vmatpush3.bf16.msra.mxu1 %v3569_v27 }
  0xff   :  { %v605_v51 = vadd.f32 %v3761_v49, %v550_v48  ;;  %v553_v52 = vmul.f32 %v3150_v50, %v3754_v45  ;;  %v3856_v53 = vpack.c.bf16 %v651_v43, %v650_v47  ;;  %v3859_v56 = vpack.c.bf16 %v650_v47, %v649_v28  ;;  %3495 = vmatprep.subr.bf16.mxu1 %v3850_v41 }
 0x100   :  { %v415_v55 = vpop.f32.mrf.mxu0  ;;  %3382 = vmatpush3.bf16.msra.mxu0 %v3572_v33  ;;  %v655_v5 = vmax.f32 %v607_v54, 0.0 }
 0x101   :  { %v653_v57 = vmax.f32 %v605_v51, 0.0  ;;  %v3863_v59 = vadd.f32 %v3761_v49, %v553_v52  ;;  %v551_v61 = vmul.f32 %v3754_v45, %v415_v55  ;;  %3431 = vmatprep.subr.bf16.mxu0 %v3850_v41  ;;  %3208 = vmatmul.mubr.bf16.gmra.mxu1 %v3856_v53 }
 0x102   :  { %3272 = vmatmul.mubr.bf16.gmra.mxu0 %v3859_v56  ;;  %v3153_v0 = vpop.f32.mrf.mxu0 }
 0x103   :  { %v656_v1 = vmax.f32 %v3863_v59, 0.0  ;;  %v606_v2 = vadd.f32 %v3761_v49, %v551_v61  ;;  %3275 = vmatprep.mubr.bf16.mxu0 %v3866_v63  ;;  %v3874_v4 = vpack.c.bf16 %v653_v57, %v652_v46  ;;  %v556_v12 = vmul.f32 %v3153_v0, %v3754_v45 }
 0x104   :  { %v428_v7 = vpop.f32.mrf.mxu0 }
 0x105   :  { %v654_v11 = vmax.f32 %v606_v2, 0.0  ;;  %v554_v13 = vmul.f32 %v3754_v45, %v428_v7  ;;  %3211 = vmatprep.mubr.bf16.mxu1 %v3874_v4  ;;  %v3881_v15 = vpack.c.bf16 %v656_v1, %v655_v5  ;;  %v611_v22 = vadd.f32 %v3761_v49, %v556_v12 }
 0x106   :  { %v3154_v14 = vpop.f32.mrf.mxu0 }
 0x107   :  { %v609_v16 = vadd.f32 %v3761_v49, %v554_v13  ;;  %v557_v17 = vmul.f32 %v3154_v14, %v3754_v45  ;;  %v3885_v18 = vpack.c.bf16 %v655_v5, %v654_v11  ;;  %v3887_v21 = vpack.c.bf16 %v654_v11, %v653_v57 }
 0x108   :  { %v431_v20 = vpop.f32.mrf.mxu0  ;;  %v659_v36 = vmax.f32 %v611_v22, 0.0 }
 0x109   :  { %v657_v24 = vmax.f32 %v609_v16, 0.0  ;;  %v612_v25 = vadd.f32 %v3761_v49, %v557_v17  ;;  %v555_v27 = vmul.f32 %v3754_v45, %v431_v20  ;;  %3212 = vmatmul.mubr.bf16.gmra.mxu1 %v3885_v18 }
 0x10a   :  { %3276 = vmatmul.mubr.bf16.gmra.mxu0 %v3887_v21  ;;  %v3157_v28 = vpop.f32.mrf.mxu0 }
 0x10b   :  { %v610_v29 = vadd.f32 %v3761_v49, %v555_v27  ;;  %v831_v30 = vpack.c.bf16 %v657_v24, %v3607_v60  ;;  %3279 = vmatprep.mubr.bf16.mxu0 %v3606_v42  ;;  %v560_v33 = vmul.f32 %v3157_v28, %v3754_v45  ;;  %v660_v38 = vmax.f32 %v612_v25, 0.0 }
 0x10c   :  { %v444_v35 = vpop.f32.mrf.mxu0 }
 0x10d   :  { %v658_v40 = vmax.f32 %v610_v29, 0.0  ;;  %v558_v43 = vmul.f32 %v3754_v45, %v444_v35  ;;  %3215 = vmatprep.mubr.bf16.mxu1 %v831_v30  ;;  %v615_v51 = vadd.f32 %v3761_v49, %v560_v33  ;;  %v3908_v0 = vpack.c.bf16 %v660_v38, %v659_v36 }
 0x10e   :  { %v3158_v46 = vpop.f32.mrf.mxu0 }
 0x10f   :  { %v613_v47 = vadd.f32 %v3761_v49, %v558_v43  ;;  %v561_v48 = vmul.f32 %v3158_v46, %v3754_v45  ;;  %v3901_v50 = vpack.c.bf16 %v659_v36, %v658_v40  ;;  %v3904_v54 = vpack.c.bf16 %v658_v40, %v657_v24 }
 0x110   :  { %v447_v52 = vpop.f32.mrf.mxu0  ;;  %v663_v13 = vmax.f32 %v615_v51, 0.0 }
 0x111   :  { %v661_v55 = vmax.f32 %v613_v47, 0.0  ;;  %v616_v57 = vadd.f32 %v3761_v49, %v561_v48  ;;  %v559_v61 = vmul.f32 %v3754_v45, %v447_v52  ;;  %3216 = vmatmul.mubr.bf16.gmra.mxu1 %v3901_v50 }
 0x112   :  { %3280 = vmatmul.mubr.bf16.gmra.mxu0 %v3904_v54  ;;  %v3161_v2 = vpop.f32.mrf.mxu0 }
 0x113   :  { %v614_v5 = vadd.f32 %v3761_v49, %v559_v61  ;;  %3283 = vmatprep.mubr.bf16.mxu0 %v3908_v0  ;;  %v3914_v7 = vpack.c.bf16 %v661_v55, %v660_v38  ;;  %v564_v11 = vmul.f32 %v3161_v2, %v3754_v45  ;;  %v664_v14 = vmax.f32 %v616_v57, 0.0 }
 0x114   :  { %v460_v12 = vpop.f32.mrf.mxu0 }
 0x115   :  { %v662_v16 = vmax.f32 %v614_v5, 0.0  ;;  %v562_v17 = vmul.f32 %v3754_v45, %v460_v12  ;;  %3219 = vmatprep.mubr.bf16.mxu1 %v3914_v7  ;;  %v619_v27 = vadd.f32 %v3761_v49, %v564_v11  ;;  %v3928_v36 = vpack.c.bf16 %v664_v14, %v663_v13 }
 0x116   :  { %v3162_v20 = vpop.f32.mrf.mxu0 }
 0x117   :  { %v617_v22 = vadd.f32 %v3761_v49, %v562_v17  ;;  %v565_v24 = vmul.f32 %v3162_v20, %v3754_v45  ;;  %v3921_v25 = vpack.c.bf16 %v663_v13, %v662_v16  ;;  %v3924_v29 = vpack.c.bf16 %v662_v16, %v661_v55 }
 0x118   :  { %v463_v28 = vpop.f32.mrf.mxu0  ;;  %v667_v48 = vmax.f32 %v619_v27, 0.0 }
 0x119   :  { %v665_v30 = vmax.f32 %v617_v22, 0.0  ;;  %v620_v33 = vadd.f32 %v3761_v49, %v565_v24  ;;  %v563_v35 = vmul.f32 %v3754_v45, %v463_v28  ;;  %3220 = vmatmul.mubr.bf16.gmra.mxu1 %v3921_v25 }
 0x11a   :  { %3284 = vmatmul.mubr.bf16.gmra.mxu0 %v3924_v29  ;;  %v3165_v38 = vpop.f32.mrf.mxu0 }
 0x11b   :  { %v618_v40 = vadd.f32 %v3761_v49, %v563_v35  ;;  %3287 = vmatprep.mubr.bf16.mxu0 %v3928_v36  ;;  %v3934_v43 = vpack.c.bf16 %v665_v30, %v664_v14  ;;  %v568_v46 = vmul.f32 %v3165_v38, %v3754_v45  ;;  %v668_v51 = vmax.f32 %v620_v33, 0.0 }
 0x11c   :  { %v476_v47 = vpop.f32.mrf.mxu0 }
 0x11d   :  { %v666_v52 = vmax.f32 %v618_v40, 0.0  ;;  %v566_v55 = vmul.f32 %v3754_v45, %v476_v47  ;;  %3223 = vmatprep.mubr.bf16.mxu1 %v3934_v43  ;;  %v623_v11 = vadd.f32 %v3761_v49, %v568_v46  ;;  %v3948_v20 = vpack.c.bf16 %v668_v51, %v667_v48 }
 0x11e   :  { %v3166_v57 = vpop.f32.mrf.mxu0 }
 0x11f   :  { %v621_v61 = vadd.f32 %v3761_v49, %v566_v55  ;;  %v569_v2 = vmul.f32 %v3166_v57, %v3754_v45  ;;  %v3941_v5 = vpack.c.bf16 %v667_v48, %v666_v52  ;;  %v3944_v13 = vpack.c.bf16 %v666_v52, %v665_v30 }
 0x120   :  { %v479_v12 = vpop.f32.mrf.mxu0  ;;  %v671_v33 = vmax.f32 %v623_v11, 0.0 }
 0x121   :  { %v669_v14 = vmax.f32 %v621_v61, 0.0  ;;  %v624_v16 = vadd.f32 %v3761_v49, %v569_v2  ;;  %v567_v17 = vmul.f32 %v3754_v45, %v479_v12  ;;  %3224 = vmatmul.mubr.bf16.gmra.mxu1 %v3941_v5 }
 0x122   :  { %3288 = vmatmul.mubr.bf16.gmra.mxu0 %v3944_v13  ;;  %v3169_v22 = vpop.f32.mrf.mxu0 }
 0x123   :  { %v622_v24 = vadd.f32 %v3761_v49, %v567_v17  ;;  %3291 = vmatprep.mubr.bf16.mxu0 %v3948_v20  ;;  %v3954_v27 = vpack.c.bf16 %v669_v14, %v668_v51  ;;  %v572_v28 = vmul.f32 %v3169_v22, %v3754_v45  ;;  %v672_v35 = vmax.f32 %v624_v16, 0.0 }
 0x124   :  { %v492_v30 = vpop.f32.mrf.mxu0 }
 0x125   :  { %v670_v38 = vmax.f32 %v622_v24, 0.0  ;;  %v570_v40 = vmul.f32 %v3754_v45, %v492_v30  ;;  %3227 = vmatprep.mubr.bf16.mxu1 %v3954_v27  ;;  %v627_v51 = vadd.f32 %v3761_v49, %v572_v28  ;;  %v3968_v12 = vpack.c.bf16 %v672_v35, %v671_v33 }
 0x126   :  { %v3170_v46 = vpop.f32.mrf.mxu0 }
 0x127   :  { %v625_v47 = vadd.f32 %v3761_v49, %v570_v40  ;;  %v573_v48 = vmul.f32 %v3170_v46, %v3754_v45  ;;  %v3961_v52 = vpack.c.bf16 %v671_v33, %v670_v38  ;;  %v3964_v57 = vpack.c.bf16 %v670_v38, %v669_v14 }
 0x128   :  { %v495_v55 = vpop.f32.mrf.mxu0  ;;  %v675_v28 = vmax.f32 %v627_v51, 0.0 }
 0x129   :  { %v673_v61 = vmax.f32 %v625_v47, 0.0  ;;  %v628_v2 = vadd.f32 %v3761_v49, %v573_v48  ;;  %v571_v11 = vmul.f32 %v3754_v45, %v495_v55  ;;  %3228 = vmatmul.mubr.bf16.gmra.mxu1 %v3961_v52 }
 0x12a   :  { %3292 = vmatmul.mubr.bf16.gmra.mxu0 %v3964_v57  ;;  %v3173_v16 = vpop.f32.mrf.mxu0 }
 0x12b   :  { %v626_v17 = vadd.f32 %v3761_v49, %v571_v11  ;;  %v576_v22 = vmul.f32 %v3173_v16, %v3754_v45  ;;  %3295 = vmatprep.mubr.bf16.mxu0 %v3968_v12  ;;  %v3975_v14 = vpack.c.bf16 %v673_v61, %v672_v35  ;;  %v676_v30 = vmax.f32 %v628_v2, 0.0 }
 0x12c   :  { %v508_v24 = vpop.f32.mrf.mxu0 }
 0x12d   :  { %v674_v38 = vmax.f32 %v626_v17, 0.0  ;;  %v574_v33 = vmul.f32 %v3754_v45, %v508_v24  ;;  %3231 = vmatprep.mubr.bf16.mxu1 %v3975_v14  ;;  %v631_v46 = vadd.f32 %v3761_v49, %v576_v22  ;;  %v3990_v17 = vpack.c.bf16 %v676_v30, %v675_v28 }
 0x12e   :  { %v3174_v40 = vpop.f32.mrf.mxu0 }
 0x12f   :  { %v629_v47 = vadd.f32 %v3761_v49, %v574_v33  ;;  %v577_v48 = vmul.f32 %v3174_v40, %v3754_v45  ;;  %v3982_v55 = vpack.c.bf16 %v675_v28, %v674_v38  ;;  %v3984_v35 = vpack.c.bf16 %v674_v38, %v673_v61 }
 0x130   :  { %v511_v11 = vpop.f32.mrf.mxu0  ;;  %v679_v22 = vmax.f32 %v631_v46, 0.0 }
 0x131   :  { %v677_v16 = vmax.f32 %v629_v47, 0.0  ;;  %v3987_v51 = vadd.f32 %v3761_v49, %v577_v48  ;;  %v575_v2 = vmul.f32 %v3754_v45, %v511_v11  ;;  %3232 = vmatmul.mubr.bf16.gmra.mxu1 %v3982_v55 }
 0x132   :  { %3296 = vmatmul.mubr.bf16.gmra.mxu0 %v3984_v35 }
 0x133   :  { %v680_v24 = vmax.f32 %v3987_v51, 0.0  ;;  %v630_v33 = vadd.f32 %v3761_v49, %v575_v2  ;;  %3299 = vmatprep.mubr.bf16.mxu0 %v3990_v17  ;;  %v3997_v61 = vpack.c.bf16 %v677_v16, %v676_v30  ;;  %v3574_v49 = vld [vmem:[#allocation3 + $0x130] sm:$0xff]   ;;  %v3575_v30 = vld [vmem:[#allocation3 + $0x128] sm:$0xff]  }
 0x135   :  { %v678_v38 = vmax.f32 %v630_v33, 0.0  ;;  %3235 = vmatprep.mubr.bf16.mxu1 %v3997_v61  ;;  %v4002_v45 = vpack.c.bf16 %v680_v24, %v679_v22 }
 0x137   :  { %v4004_v28 = vpack.c.bf16 %v679_v22, %v678_v38  ;;  %v4006_v40 = vpack.c.bf16 %v678_v38, %v677_v16 }
 0x139   :  { %3236 = vmatmul.mubr.bf16.gmra.mxu1 %v4004_v28 }
 0x13a   :  { %3300 = vmatmul.mubr.bf16.gmra.mxu0 %v4006_v40  ;;  %3319 = vmatprep.mubr.bf16.mxu1 %v3773_v6  ;;  %v3576_v6 = vld [vmem:[#allocation3 + $0x120] sm:$0xff]  }
 0x13b   :  { %3383 = vmatprep.mubr.bf16.mxu0 %v3776_v9  ;;  %v3577_v9 = vld [vmem:[#allocation3 + $0x118] sm:$0xff]  }
 0x141   :  { %3320 = vmatmul.mubr.bf16.vlgmr.msra.gmra.mxu1 %v3778_v10 }
 0x142   :  { %3384 = vmatmul.mubr.bf16.vlgmr.msra.gmra.mxu0 %v3787_v19  ;;  %3503 = vmatpush3.bf16.msra.mxu1 %v3850_v41  ;;  %v3578_v19 = vld [vmem:[#allocation3 + $0x110] sm:$0xff]  }
 0x143   :  { %3323 = vmatprep.mubr.bf16.mxu1 %v3797_v34  ;;  %3387 = vmatprep.mubr.bf16.mxu0 %v3794_v31  ;;  %v3579_v31 = vld [vmem:[#allocation3 + $0x108] sm:$0xff]  }
 0x144   :  { %3496 = vmatprep.subr.bf16.mxu1 %v3574_v49  ;;  %3432 = vmatpush3.bf16.msra.mxu0 %v3850_v41 }
 0x145   :  { %3433 = vmatprep.subr.bf16.mxu0 %v3574_v49 }
 0x146   :  { %3504 = vmatpush3.bf16.msra.mxu1 %v3574_v49 }
 0x147   :  { %3497 = vmatprep.subr.bf16.mxu1 %v3575_v30 }
 0x148   :  { %3434 = vmatpush3.bf16.msra.mxu0 %v3574_v49 }
 0x149   :  { %3324 = vmatmul.mubr.bf16.gmra.mxu1 %v3801_v39  ;;  %3435 = vmatprep.subr.bf16.mxu0 %v3575_v30 }
 0x14a   :  { %3388 = vmatmul.mubr.bf16.gmra.mxu0 %v3807_v44  ;;  %3327 = vmatprep.mubr.bf16.mxu1 %v3817_v62  ;;  %v3580_v44 = vld [vmem:[#allocation3 + $0x100] sm:$0xff]  }
 0x14b   :  { %3391 = vmatprep.mubr.bf16.mxu0 %v3814_v58  ;;  %3505 = vmatpush3.bf16.msra.mxu1 %v3575_v30  ;;  %v1875_v58 = vpack.c.bf16 %v3607_v60, %v656_v1 }
 0x14c   :  { %3498 = vmatprep.subr.bf16.mxu1 %v3576_v6  ;;  %3436 = vmatpush3.bf16.msra.mxu0 %v3575_v30 }
 0x14d   :  { %3437 = vmatprep.subr.bf16.mxu0 %v3576_v6 }
 0x14f   :  { %3506 = vmatpush3.bf16.msra.mxu1 %v3576_v6 }
 0x150   :  { %3499 = vmatprep.subr.bf16.mxu1 %v3577_v9  ;;  %3438 = vmatpush3.bf16.msra.mxu0 %v3576_v6 }
 0x151   :  { %3328 = vmatmul.mubr.bf16.gmra.mxu1 %v3821_v3  ;;  %3439 = vmatprep.subr.bf16.mxu0 %v3577_v9 }
 0x152   :  { %3392 = vmatmul.mubr.bf16.gmra.mxu0 %v3827_v8  ;;  %3331 = vmatprep.mubr.bf16.mxu1 %v3837_v26  ;;  %v1887_v8 = vpack.c.bf16 %v3607_v60, %v680_v24 }
 0x153   :  { %3395 = vmatprep.mubr.bf16.mxu0 %v3834_v23  ;;  %3507 = vmatpush3.bf16.msra.mxu1 %v3577_v9 }
 0x154   :  { %3500 = vmatprep.subr.bf16.mxu1 %v3578_v19  ;;  %3440 = vmatpush3.bf16.msra.mxu0 %v3577_v9 }
 0x155   :  { %3441 = vmatprep.subr.bf16.mxu0 %v3578_v19 }
 0x157   :  { %3508 = vmatpush3.bf16.msra.mxu1 %v3578_v19 }
 0x158   :  { %3501 = vmatprep.subr.bf16.mxu1 %v3579_v31  ;;  %3442 = vmatpush3.bf16.msra.mxu0 %v3578_v19 }
 0x159   :  { %3332 = vmatmul.mubr.bf16.gmra.mxu1 %v3841_v32  ;;  %3443 = vmatprep.subr.bf16.mxu0 %v3579_v31 }
 0x15a   :  { %3396 = vmatmul.mubr.bf16.gmra.mxu0 %v3847_v37  ;;  %3335 = vmatprep.mubr.bf16.mxu1 %v3859_v56 }
 0x15b   :  { %3399 = vmatprep.mubr.bf16.mxu0 %v3856_v53  ;;  %3509 = vmatpush3.bf16.msra.mxu1 %v3579_v31 }
 0x15c   :  { %3502 = vmatprep.subr.bf16.mxu1 %v3580_v44  ;;  %3444 = vmatpush3.bf16.msra.mxu0 %v3579_v31 }
 0x15d   :  { %3445 = vmatprep.subr.bf16.mxu0 %v3580_v44 }
 0x15f   :  { %3510 = vmatpush3.bf16.msra.mxu1 %v3580_v44 }
 0x160   :  { %3446 = vmatpush3.bf16.msra.mxu0 %v3580_v44 }
 0x161   :  { %3336 = vmatmul.mubr.bf16.gmra.mxu1 %v3866_v63 }
 0x162   :  { %3400 = vmatmul.mubr.bf16.gmra.mxu0 %v3874_v4  ;;  %3339 = vmatprep.mubr.bf16.mxu1 %v3887_v21 }
 0x163   :  { %3403 = vmatprep.mubr.bf16.mxu0 %v3885_v18 }
 0x169   :  { %3340 = vmatmul.mubr.bf16.gmra.mxu1 %v3881_v15 }
 0x16a   :  { %3404 = vmatmul.mubr.bf16.gmra.mxu0 %v1875_v58  ;;  %3343 = vmatprep.mubr.bf16.mxu1 %v3904_v54 }
 0x16b   :  { %3407 = vmatprep.mubr.bf16.mxu0 %v3901_v50 }
 0x171   :  { %3344 = vmatmul.mubr.bf16.gmra.mxu1 %v3908_v0 }
 0x172   :  { %3408 = vmatmul.mubr.bf16.gmra.mxu0 %v3914_v7  ;;  %3347 = vmatprep.mubr.bf16.mxu1 %v3924_v29 }
 0x173   :  { %3411 = vmatprep.mubr.bf16.mxu0 %v3921_v25 }
 0x179   :  { %3348 = vmatmul.mubr.bf16.gmra.mxu1 %v3928_v36 }
 0x17a   :  { %3412 = vmatmul.mubr.bf16.gmra.mxu0 %v3934_v43  ;;  %3351 = vmatprep.mubr.bf16.mxu1 %v3944_v13 }
 0x17b   :  { %3415 = vmatprep.mubr.bf16.mxu0 %v3941_v5 }
 0x181   :  { %3352 = vmatmul.mubr.bf16.gmra.mxu1 %v3948_v20 }
 0x182   :  { %3416 = vmatmul.mubr.bf16.gmra.mxu0 %v3954_v27  ;;  %3355 = vmatprep.mubr.bf16.mxu1 %v3964_v57 }
 0x183   :  { %3419 = vmatprep.mubr.bf16.mxu0 %v3961_v52 }
 0x189   :  { %3356 = vmatmul.mubr.bf16.gmra.mxu1 %v3968_v12 }
 0x18a   :  { %3420 = vmatmul.mubr.bf16.gmra.mxu0 %v3975_v14  ;;  %3359 = vmatprep.mubr.bf16.mxu1 %v3984_v35 }
 0x18b   :  { %3423 = vmatprep.mubr.bf16.mxu0 %v3982_v55 }
 0x191   :  { %3360 = vmatmul.mubr.bf16.gmra.mxu1 %v3990_v17 }
 0x192   :  { %3424 = vmatmul.mubr.bf16.gmra.mxu0 %v3997_v61  ;;  %3363 = vmatprep.mubr.bf16.mxu1 %v4006_v40 }
 0x193   :  { %3427 = vmatprep.mubr.bf16.mxu0 %v4004_v28 }
 0x199   :  { %3364 = vmatmul.mubr.bf16.gmra.mxu1 %v4002_v45 }
 0x19a   :  { %3428 = vmatmul.mubr.bf16.gmra.mxu0 %v1887_v8  ;;  %3451 = vmatprep.mubr.bf16.mxu1 %v3801_v39 }
 0x19b   :  { %3447 = vmatprep.mubr.bf16.mxu0 %v3778_v10 }
 0x1a1   :  { %v3257_v23 = vpop.f32.mrf.mxu0  ;;  %v3193_v37 = vpop.f32.mrf.mxu1  ;;  %3452 = vmatmul.mubr.bf16.vlgmr.msra.gmra.mxu1 %v3817_v62 }
 0x1a2   :  { %3448 = vmatmul.mubr.bf16.vlgmr.msra.gmra.mxu0 %v3797_v34  ;;  %v4068_v41 = vadd.f32 %v3257_v23, %v3193_v37  ;;  %3455 = vmatprep.mubr.bf16.mxu1 %v3821_v3 }
 0x1a3   :  { %v1215_v53 = vpop.f32.mrf.mxu0  ;;  %v942_v59 = vpop.f32.mrf.mxu1 }
 0x1a4   :  { %v4071_v60 = vadd.f32 %v1215_v53, %v942_v59 }
 0x1a5   :  { %v3258_v1 = vpop.f32.mrf.mxu0  ;;  %v3194_v4 = vpop.f32.mrf.mxu1 }
 0x1a6   :  { %v4073_v18 = vadd.f32 %v3258_v1, %v3194_v4 }
 0x1a7   :  { %v1218_v10 = vpop.f32.mrf.mxu0  ;;  %v945_v39 = vpop.f32.mrf.mxu1 }
 0x1a8   :  { %v4075_v50 = vadd.f32 %v1218_v10, %v945_v39 }
 0x1a9   :  { %v3197_v54 = vpop.f32.mrf.mxu1  ;;  %v3261_v34 = vpop.f32.mrf.mxu0  ;;  %3456 = vmatmul.mubr.bf16.gmra.mxu1 %v3837_v26 }
 0x1aa   :  { %v4078_v62 = vadd.f32 %v3261_v34, %v3197_v54  ;;  %3459 = vmatprep.mubr.bf16.mxu1 %v3841_v32 }
 0x1ab   :  { %v958_v3 = vpop.f32.mrf.mxu1  ;;  %v1231_v7 = vpop.f32.mrf.mxu0 }
 0x1ac   :  { %v4081_v25 = vadd.f32 %v1231_v7, %v958_v3 }
 0x1ad   :  { %v3198_v43 = vpop.f32.mrf.mxu1  ;;  %v3262_v5 = vpop.f32.mrf.mxu0 }
 0x1ae   :  { %v4083_v27 = vadd.f32 %v3262_v5, %v3198_v43 }
 0x1af   :  { %v961_v52 = vpop.f32.mrf.mxu1  ;;  %v1234_v14 = vpop.f32.mrf.mxu0 }
 0x1b0   :  { %v4085_v46 = vadd.f32 %v1234_v14, %v961_v52 }
 0x1b1   :  { %v3201_v47 = vpop.f32.mrf.mxu1  ;;  %3460 = vmatmul.mubr.bf16.gmra.mxu1 %v3859_v56 }
 0x1b2   :  { %v3265_v48 = vpop.f32.mrf.mxu0  ;;  %3463 = vmatprep.mubr.bf16.mxu1 %v3866_v63 }
 0x1b3   :  { %v4088_v26 = vadd.f32 %v3265_v48, %v3201_v47  ;;  %v974_v32 = vpop.f32.mrf.mxu1 }
 0x1b4   :  { %v1247_v55 = vpop.f32.mrf.mxu0 }
 0x1b5   :  { %v4091_v11 = vadd.f32 %v1247_v55, %v974_v32  ;;  %v3202_v16 = vpop.f32.mrf.mxu1 }
 0x1b6   :  { %v3266_v51 = vpop.f32.mrf.mxu0 }
 0x1b7   :  { %v4093_v2 = vadd.f32 %v3266_v51, %v3202_v16  ;;  %v977_v22 = vpop.f32.mrf.mxu1 }
 0x1b8   :  { %v1250_v24 = vpop.f32.mrf.mxu0 }
 0x1b9   :  { %v4095_v33 = vadd.f32 %v1250_v24, %v977_v22  ;;  %v3205_v61 = vpop.f32.mrf.mxu1  ;;  %3464 = vmatmul.mubr.bf16.gmra.mxu1 %v3887_v21 }
 0x1ba   :  { %v3269_v38 = vpop.f32.mrf.mxu0  ;;  %3467 = vmatprep.mubr.bf16.mxu1 %v3881_v15 }
 0x1bb   :  { %v4098_v56 = vadd.f32 %v3269_v38, %v3205_v61  ;;  %v990_v63 = vpop.f32.mrf.mxu1 }
 0x1bc   :  { %v1263_v28 = vpop.f32.mrf.mxu0 }
 0x1bd   :  { %v4101_v49 = vadd.f32 %v1263_v28, %v990_v63  ;;  %v3206_v30 = vpop.f32.mrf.mxu1 }
 0x1be   :  { %v3270_v6 = vpop.f32.mrf.mxu0 }
 0x1bf   :  { %v4103_v9 = vadd.f32 %v3270_v6, %v3206_v30  ;;  %v993_v19 = vpop.f32.mrf.mxu1 }
 0x1c0   :  { %v1266_v31 = vpop.f32.mrf.mxu0 }
 0x1c1   :  { %v4105_v44 = vadd.f32 %v1266_v31, %v993_v19  ;;  %v3209_v58 = vpop.f32.mrf.mxu1  ;;  %3468 = vmatmul.mubr.bf16.gmra.mxu1 %v3606_v42 }
 0x1c2   :  { %v3273_v8 = vpop.f32.mrf.mxu0  ;;  %3471 = vmatprep.mubr.bf16.mxu1 %v3908_v0 }
 0x1c3   :  { %v4108_v21 = vadd.f32 %v3273_v8, %v3209_v58  ;;  %v1006_v15 = vpop.f32.mrf.mxu1 }
 0x1c4   :  { %v1279_v23 = vpop.f32.mrf.mxu0 }
 0x1c5   :  { %v4111_v37 = vadd.f32 %v1279_v23, %v1006_v15  ;;  %v3210_v53 = vpop.f32.mrf.mxu1 }
 0x1c6   :  { %v3274_v59 = vpop.f32.mrf.mxu0 }
 0x1c7   :  { %v4113_v1 = vadd.f32 %v3274_v59, %v3210_v53  ;;  %v1009_v4 = vpop.f32.mrf.mxu1 }
 0x1c8   :  { %v1282_v10 = vpop.f32.mrf.mxu0 }
 0x1c9   :  { %v4115_v39 = vadd.f32 %v1282_v10, %v1009_v4  ;;  %v3213_v54 = vpop.f32.mrf.mxu1  ;;  %3472 = vmatmul.mubr.bf16.gmra.mxu1 %v3924_v29 }
 0x1ca   :  { %v3277_v34 = vpop.f32.mrf.mxu0  ;;  %3475 = vmatprep.mubr.bf16.mxu1 %v3928_v36 }
 0x1cb   :  { %v4118_v3 = vadd.f32 %v3277_v34, %v3213_v54  ;;  %v1022_v0 = vpop.f32.mrf.mxu1 }
 0x1cc   :  { %v1295_v7 = vpop.f32.mrf.mxu0 }
 0x1cd   :  { %v4121_v43 = vadd.f32 %v1295_v7, %v1022_v0  ;;  %v3214_v5 = vpop.f32.mrf.mxu1 }
 0x1ce   :  { %v3278_v52 = vpop.f32.mrf.mxu0 }
 0x1cf   :  { %v4123_v14 = vadd.f32 %v3278_v52, %v3214_v5  ;;  %v1025_v47 = vpop.f32.mrf.mxu1 }
 0x1d0   :  { %v1298_v48 = vpop.f32.mrf.mxu0 }
 0x1d1   :  { %v4125_v32 = vadd.f32 %v1298_v48, %v1025_v47  ;;  %v3217_v55 = vpop.f32.mrf.mxu1  ;;  %3476 = vmatmul.mubr.bf16.gmra.mxu1 %v3944_v13 }
 0x1d2   :  { %v3281_v16 = vpop.f32.mrf.mxu0  ;;  %3479 = vmatprep.mubr.bf16.mxu1 %v3948_v20 }
 0x1d3   :  { %v4128_v29 = vadd.f32 %v3281_v16, %v3217_v55  ;;  %v1038_v36 = vpop.f32.mrf.mxu1 }
 0x1d4   :  { %v1311_v51 = vpop.f32.mrf.mxu0 }
 0x1d5   :  { %v4131_v22 = vadd.f32 %v1311_v51, %v1038_v36  ;;  %v3218_v24 = vpop.f32.mrf.mxu1 }
 0x1d6   :  { %v3282_v61 = vpop.f32.mrf.mxu0 }
 0x1d7   :  { %v4133_v38 = vadd.f32 %v3282_v61, %v3218_v24  ;;  %v1041_v63 = vpop.f32.mrf.mxu1 }
 0x1d8   :  { %v1314_v28 = vpop.f32.mrf.mxu0 }
 0x1d9   :  { %v4135_v30 = vadd.f32 %v1314_v28, %v1041_v63  ;;  %v3221_v6 = vpop.f32.mrf.mxu1  ;;  %3480 = vmatmul.mubr.bf16.gmra.mxu1 %v3964_v57 }
 0x1da   :  { %v3285_v19 = vpop.f32.mrf.mxu0  ;;  %3483 = vmatprep.mubr.bf16.mxu1 %v3968_v12 }
 0x1db   :  { %v4138_v13 = vadd.f32 %v3285_v19, %v3221_v6  ;;  %v1054_v20 = vpop.f32.mrf.mxu1 }
 0x1dc   :  { %v1327_v31 = vpop.f32.mrf.mxu0 }
 0x1dd   :  { %v4141_v58 = vadd.f32 %v1327_v31, %v1054_v20  ;;  %v3222_v8 = vpop.f32.mrf.mxu1 }
 0x1de   :  { %v3286_v15 = vpop.f32.mrf.mxu0 }
 0x1df   :  { %v4143_v23 = vadd.f32 %v3286_v15, %v3222_v8  ;;  %v1057_v53 = vpop.f32.mrf.mxu1 }
 0x1e0   :  { %v1330_v59 = vpop.f32.mrf.mxu0 }
 0x1e1   :  { %v4145_v4 = vadd.f32 %v1330_v59, %v1057_v53  ;;  %v3225_v10 = vpop.f32.mrf.mxu1  ;;  %3484 = vmatmul.mubr.bf16.gmra.mxu1 %v3984_v35 }
 0x1e2   :  { %v3289_v54 = vpop.f32.mrf.mxu0  ;;  %3487 = vmatprep.mubr.bf16.mxu1 %v3990_v17 }
 0x1e3   :  { %v4148_v57 = vadd.f32 %v3289_v54, %v3225_v10  ;;  %v1070_v12 = vpop.f32.mrf.mxu1 }
 0x1e4   :  { %v1343_v34 = vpop.f32.mrf.mxu0 }
 0x1e5   :  { %v4151_v0 = vadd.f32 %v1343_v34, %v1070_v12  ;;  %v3226_v7 = vpop.f32.mrf.mxu1 }
 0x1e6   :  { %v3290_v5 = vpop.f32.mrf.mxu0 }
 0x1e7   :  { %v4153_v52 = vadd.f32 %v3290_v5, %v3226_v7  ;;  %v1073_v47 = vpop.f32.mrf.mxu1 }
 0x1e8   :  { %v1346_v48 = vpop.f32.mrf.mxu0 }
 0x1e9   :  { %v4155_v55 = vadd.f32 %v1346_v48, %v1073_v47  ;;  %v3229_v16 = vpop.f32.mrf.mxu1  ;;  %3488 = vmatmul.mubr.bf16.gmra.mxu1 %v4006_v40 }
 0x1ea   :  { %v3293_v36 = vpop.f32.mrf.mxu0  ;;  %3491 = vmatprep.mubr.bf16.mxu1 %v4002_v45 }
 0x1eb   :  { %v4158_v35 = vadd.f32 %v3293_v36, %v3229_v16  ;;  %v1086_v17 = vpop.f32.mrf.mxu1 }
 0x1ec   :  { %v1359_v51 = vpop.f32.mrf.mxu0 }
 0x1ed   :  { %v4161_v24 = vadd.f32 %v1359_v51, %v1086_v17  ;;  %v3230_v61 = vpop.f32.mrf.mxu1 }
 0x1ee   :  { %v3294_v63 = vpop.f32.mrf.mxu0 }
 0x1ef   :  { %v4163_v28 = vadd.f32 %v3294_v63, %v3230_v61  ;;  %v1089_v6 = vpop.f32.mrf.mxu1 }
 0x1f0   :  { %v1362_v19 = vpop.f32.mrf.mxu0 }
 0x1f1   :  { %v4165_v20 = vadd.f32 %v1362_v19, %v1089_v6  ;;  %v3233_v31 = vpop.f32.mrf.mxu1  ;;  %3492 = vmatmul.mubr.bf16.gmra.mxu1 %v3606_v42 }
 0x1f2   :  { %v3297_v8 = vpop.f32.mrf.mxu0 }
 0x1f3   :  { %v4168_v40 = vadd.f32 %v3297_v8, %v3233_v31  ;;  %v1102_v15 = vpop.f32.mrf.mxu1 }
 0x1f4   :  { %v1375_v45 = vpop.f32.mrf.mxu0 }
 0x1f5   :  { %v4170_v53 = vadd.f32 %v1375_v45, %v1102_v15  ;;  %v3234_v59 = vpop.f32.mrf.mxu1 }
 0x1f6   :  { %v3298_v10 = vpop.f32.mrf.mxu0 }
 0x1f7   :  { %v4172_v54 = vadd.f32 %v3298_v10, %v3234_v59  ;;  %v1105_v12 = vpop.f32.mrf.mxu1 }
 0x1f8   :  { %v1378_v34 = vpop.f32.mrf.mxu0 }
 0x1f9   :  { %v4174_v7 = vadd.f32 %v1378_v34, %v1105_v12  ;;  %v3237_v5 = vpop.f32.mrf.mxu1 }
 0x1fa   :  { %v3301_v47 = vpop.f32.mrf.mxu0 }
 0x1fb   :  { %v4176_v48 = vadd.f32 %v3301_v47, %v3237_v5  ;;  %v1118_v16 = vpop.f32.mrf.mxu1 }
 0x1fc   :  { %v1391_v42 = vpop.f32.mrf.mxu0 }
 0x1fd   :  { %v4178_v36 = vadd.f32 %v1391_v42, %v1118_v16  ;;  %v3238_v17 = vpop.f32.mrf.mxu1 }
 0x1fe   :  { %v3302_v51 = vpop.f32.mrf.mxu0 }
 0x1ff   :  { %v4180_v61 = vadd.f32 %v3302_v51, %v3238_v17  ;;  %v1121_v63 = vpop.f32.mrf.mxu1 }
 0x200   :  { %v1394_v6 = vpop.f32.mrf.mxu0 }
 0x201   :  { %v4182_v19 = vadd.f32 %v1394_v6, %v1121_v63  ;;  %v3321_v31 = vpop.f32.mrf.mxu1 }
 0x202   :  { %v3385_v8 = vpop.f32.mrf.mxu0  ;;  %v1770_v15 = vadd.f32 %v3321_v31, %v4068_v41 }
 0x203   :  { %v1577_v45 = vpop.f32.mrf.mxu1 }
 0x204   :  { %v1987_v59 = vpop.f32.mrf.mxu0  ;;  %v4185_v10 = vadd.f32 %v3385_v8, %v1770_v15  ;;  %v1768_v12 = vadd.f32 %v1577_v45, %v4071_v60 }
 0x205   :  { %v3322_v34 = vpop.f32.mrf.mxu1 }
 0x206   :  { %v3386_v5 = vpop.f32.mrf.mxu0  ;;  %v4188_v47 = vadd.f32 %v1987_v59, %v1768_v12  ;;  %v1771_v16 = vadd.f32 %v3322_v34, %v4073_v18 }
 0x207   :  { %v1580_v42 = vpop.f32.mrf.mxu1 }
 0x208   :  { %v1990_v17 = vpop.f32.mrf.mxu0  ;;  %v4191_v51 = vadd.f32 %v3386_v5, %v1771_v16  ;;  %v1769_v63 = vadd.f32 %v1580_v42, %v4075_v50 }
 0x209   :  { %v3325_v6 = vpop.f32.mrf.mxu1 }
 0x20a   :  { %v3389_v41 = vpop.f32.mrf.mxu0  ;;  %v4194_v31 = vadd.f32 %v1990_v17, %v1769_v63  ;;  %v1774_v8 = vadd.f32 %v3325_v6, %v4078_v62 }
 0x20b   :  { %v1593_v15 = vpop.f32.mrf.mxu1 }
 0x20c   :  { %v2003_v60 = vpop.f32.mrf.mxu0  ;;  %v4197_v45 = vadd.f32 %v3389_v41, %v1774_v8  ;;  %v1772_v59 = vadd.f32 %v1593_v15, %v4081_v25 }
 0x20d   :  { %v3326_v12 = vpop.f32.mrf.mxu1 }
 0x20e   :  { %v3390_v18 = vpop.f32.mrf.mxu0  ;;  %v4200_v34 = vadd.f32 %v2003_v60, %v1772_v59  ;;  %v1775_v5 = vadd.f32 %v3326_v12, %v4083_v27 }
 0x20f   :  { %v1596_v16 = vpop.f32.mrf.mxu1 }
 0x210   :  { %v2006_v50 = vpop.f32.mrf.mxu0  ;;  %v4203_v42 = vadd.f32 %v3390_v18, %v1775_v5  ;;  %v1773_v17 = vadd.f32 %v1596_v16, %v4085_v46 }
 0x211   :  { %v3329_v63 = vpop.f32.mrf.mxu1 }
 0x212   :  { %v3393_v62 = vpop.f32.mrf.mxu0  ;;  %v4206_v6 = vadd.f32 %v2006_v50, %v1773_v17  ;;  %v1778_v41 = vadd.f32 %v3329_v63, %v4088_v26 }
 0x213   :  { %v1609_v8 = vpop.f32.mrf.mxu1 }
 0x214   :  { %v2019_v25 = vpop.f32.mrf.mxu0  ;;  %v4209_v15 = vadd.f32 %v3393_v62, %v1778_v41  ;;  %v1776_v60 = vadd.f32 %v1609_v8, %v4091_v11 }
 0x215   :  { %v3330_v59 = vpop.f32.mrf.mxu1 }
 0x216   :  { %v3394_v27 = vpop.f32.mrf.mxu0  ;;  %v4212_v12 = vadd.f32 %v2019_v25, %v1776_v60  ;;  %v1779_v18 = vadd.f32 %v3330_v59, %v4093_v2 }
 0x217   :  { %v1612_v5 = vpop.f32.mrf.mxu1 }
 0x218   :  { %v2022_v46 = vpop.f32.mrf.mxu0  ;;  %v4215_v16 = vadd.f32 %v3394_v27, %v1779_v18  ;;  %v1777_v50 = vadd.f32 %v1612_v5, %v4095_v33 }
 0x219   :  { %v3333_v17 = vpop.f32.mrf.mxu1 }
 0x21a   :  { %v3397_v26 = vpop.f32.mrf.mxu0  ;;  %v4218_v63 = vadd.f32 %v2022_v46, %v1777_v50  ;;  %v1782_v62 = vadd.f32 %v3333_v17, %v4098_v56 }
 0x21b   :  { %v1625_v41 = vpop.f32.mrf.mxu1 }
 0x21c   :  { %v2035_v11 = vpop.f32.mrf.mxu0  ;;  %v4221_v8 = vadd.f32 %v3397_v26, %v1782_v62  ;;  %v1780_v25 = vadd.f32 %v1625_v41, %v4101_v49 }
 0x21d   :  { %v3334_v60 = vpop.f32.mrf.mxu1 }
 0x21e   :  { %v3398_v2 = vpop.f32.mrf.mxu0  ;;  %v4224_v59 = vadd.f32 %v2035_v11, %v1780_v25  ;;  %v1783_v27 = vadd.f32 %v3334_v60, %v4103_v9 }
 0x21f   :  { %v1628_v18 = vpop.f32.mrf.mxu1 }
 0x220   :  { %v2038_v33 = vpop.f32.mrf.mxu0  ;;  %v4227_v5 = vadd.f32 %v3398_v2, %v1783_v27  ;;  %v1781_v46 = vadd.f32 %v1628_v18, %v4105_v44 }
 0x221   :  { %v3337_v50 = vpop.f32.mrf.mxu1 }
 0x222   :  { %v3401_v56 = vpop.f32.mrf.mxu0  ;;  %v4230_v17 = vadd.f32 %v2038_v33, %v1781_v46  ;;  %v1786_v26 = vadd.f32 %v3337_v50, %v4108_v21 }
 0x223   :  { %v1641_v62 = vpop.f32.mrf.mxu1 }
 0x224   :  { %v2051_v49 = vpop.f32.mrf.mxu0  ;;  %v4233_v41 = vadd.f32 %v3401_v56, %v1786_v26  ;;  %v1784_v11 = vadd.f32 %v1641_v62, %v4111_v37 }
 0x225   :  { %v3338_v25 = vpop.f32.mrf.mxu1 }
 0x226   :  { %v3402_v9 = vpop.f32.mrf.mxu0  ;;  %v4236_v60 = vadd.f32 %v2051_v49, %v1784_v11  ;;  %v1787_v2 = vadd.f32 %v3338_v25, %v4113_v1 }
 0x227   :  { %v1644_v27 = vpop.f32.mrf.mxu1 }
 0x228   :  { %v2054_v44 = vpop.f32.mrf.mxu0  ;;  %v4239_v18 = vadd.f32 %v3402_v9, %v1787_v2  ;;  %v1785_v33 = vadd.f32 %v1644_v27, %v4115_v39 }
 0x229   :  { %v3341_v46 = vpop.f32.mrf.mxu1 }
 0x22a   :  { %v3405_v21 = vpop.f32.mrf.mxu0  ;;  %v4242_v50 = vadd.f32 %v2054_v44, %v1785_v33  ;;  %v1790_v56 = vadd.f32 %v3341_v46, %v4118_v3 }
 0x22b   :  { %v1657_v26 = vpop.f32.mrf.mxu1 }
 0x22c   :  { %v2067_v37 = vpop.f32.mrf.mxu0  ;;  %v4245_v62 = vadd.f32 %v3405_v21, %v1790_v56  ;;  %v1788_v49 = vadd.f32 %v1657_v26, %v4121_v43 }
 0x22d   :  { %v3342_v11 = vpop.f32.mrf.mxu1 }
 0x22e   :  { %v3406_v1 = vpop.f32.mrf.mxu0  ;;  %v4248_v25 = vadd.f32 %v2067_v37, %v1788_v49  ;;  %v1791_v9 = vadd.f32 %v3342_v11, %v4123_v14 }
 0x22f   :  { %v1660_v2 = vpop.f32.mrf.mxu1 }
 0x230   :  { %v2070_v39 = vpop.f32.mrf.mxu0  ;;  %v4251_v27 = vadd.f32 %v3406_v1, %v1791_v9  ;;  %v1789_v44 = vadd.f32 %v1660_v2, %v4125_v32 }
 0x231   :  { %v3345_v33 = vpop.f32.mrf.mxu1 }
 0x232   :  { %v3409_v3 = vpop.f32.mrf.mxu0  ;;  %v4254_v46 = vadd.f32 %v2070_v39, %v1789_v44  ;;  %v1794_v21 = vadd.f32 %v3345_v33, %v4128_v29 }
 0x233   :  { %v1673_v56 = vpop.f32.mrf.mxu1 }
 0x234   :  { %v2083_v43 = vpop.f32.mrf.mxu0  ;;  %v4257_v26 = vadd.f32 %v3409_v3, %v1794_v21  ;;  %v1792_v37 = vadd.f32 %v1673_v56, %v4131_v22 }
 0x235   :  { %v3346_v49 = vpop.f32.mrf.mxu1 }
 0x236   :  { %v3410_v14 = vpop.f32.mrf.mxu0  ;;  %v4260_v11 = vadd.f32 %v2083_v43, %v1792_v37  ;;  %v1795_v1 = vadd.f32 %v3346_v49, %v4133_v38 }
 0x237   :  { %v1676_v9 = vpop.f32.mrf.mxu1 }
 0x238   :  { %v2086_v32 = vpop.f32.mrf.mxu0  ;;  %v4263_v2 = vadd.f32 %v3410_v14, %v1795_v1  ;;  %v1793_v39 = vadd.f32 %v1676_v9, %v4135_v30 }
 0x239   :  { %v3349_v44 = vpop.f32.mrf.mxu1 }
 0x23a   :  { %v3413_v29 = vpop.f32.mrf.mxu0  ;;  %v4266_v33 = vadd.f32 %v2086_v32, %v1793_v39  ;;  %v1798_v3 = vadd.f32 %v3349_v44, %v4138_v13 }
 0x23b   :  { %v1689_v21 = vpop.f32.mrf.mxu1 }
 0x23c   :  { %v2099_v22 = vpop.f32.mrf.mxu0  ;;  %v4269_v56 = vadd.f32 %v3413_v29, %v1798_v3  ;;  %v1796_v43 = vadd.f32 %v1689_v21, %v4141_v58 }
 0x23d   :  { %v3350_v37 = vpop.f32.mrf.mxu1 }
 0x23e   :  { %v3414_v38 = vpop.f32.mrf.mxu0  ;;  %v4272_v49 = vadd.f32 %v2099_v22, %v1796_v43  ;;  %v1799_v14 = vadd.f32 %v3350_v37, %v4143_v23 }
 0x23f   :  { %v1692_v1 = vpop.f32.mrf.mxu1 }
 0x240   :  { %v2102_v30 = vpop.f32.mrf.mxu0  ;;  %v4275_v9 = vadd.f32 %v3414_v38, %v1799_v14  ;;  %v1797_v32 = vadd.f32 %v1692_v1, %v4145_v4 }
 0x241   :  { %v3353_v39 = vpop.f32.mrf.mxu1 }
 0x242   :  { %v3417_v13 = vpop.f32.mrf.mxu0  ;;  %v4278_v44 = vadd.f32 %v2102_v30, %v1797_v32  ;;  %v1802_v29 = vadd.f32 %v3353_v39, %v4148_v57 }
 0x243   :  { %v1705_v3 = vpop.f32.mrf.mxu1 }
 0x244   :  { %v2115_v58 = vpop.f32.mrf.mxu0  ;;  %v4281_v21 = vadd.f32 %v3417_v13, %v1802_v29  ;;  %v1800_v22 = vadd.f32 %v1705_v3, %v4151_v0 }
 0x245   :  { %v3354_v43 = vpop.f32.mrf.mxu1 }
 0x246   :  { %v3418_v23 = vpop.f32.mrf.mxu0  ;;  %v4284_v37 = vadd.f32 %v2115_v58, %v1800_v22  ;;  %v1803_v38 = vadd.f32 %v3354_v43, %v4153_v52 }
 0x247   :  { %v1708_v14 = vpop.f32.mrf.mxu1 }
 0x248   :  { %v2118_v4 = vpop.f32.mrf.mxu0  ;;  %v4287_v1 = vadd.f32 %v3418_v23, %v1803_v38  ;;  %v1801_v30 = vadd.f32 %v1708_v14, %v4155_v55 }
 0x249   :  { %v3357_v32 = vpop.f32.mrf.mxu1 }
 0x24a   :  { %v3421_v57 = vpop.f32.mrf.mxu0  ;;  %v4290_v39 = vadd.f32 %v2118_v4, %v1801_v30  ;;  %v1806_v13 = vadd.f32 %v3357_v32, %v4158_v35 }
 0x24b   :  { %v1721_v29 = vpop.f32.mrf.mxu1 }
 0x24c   :  { %v2131_v0 = vpop.f32.mrf.mxu0  ;;  %v4293_v3 = vadd.f32 %v3421_v57, %v1806_v13  ;;  %v1804_v58 = vadd.f32 %v1721_v29, %v4161_v24 }
 0x24d   :  { %v3358_v22 = vpop.f32.mrf.mxu1 }
 0x24e   :  { %v3422_v52 = vpop.f32.mrf.mxu0  ;;  %v4296_v43 = vadd.f32 %v2131_v0, %v1804_v58  ;;  %v1807_v23 = vadd.f32 %v3358_v22, %v4163_v28 }
 0x24f   :  { %v1724_v38 = vpop.f32.mrf.mxu1 }
 0x250   :  { %v2134_v55 = vpop.f32.mrf.mxu0  ;;  %v4299_v14 = vadd.f32 %v3422_v52, %v1807_v23  ;;  %v1805_v4 = vadd.f32 %v1724_v38, %v4165_v20 }
 0x251   :  { %v3361_v30 = vpop.f32.mrf.mxu1 }
 0x252   :  { %v3425_v35 = vpop.f32.mrf.mxu0  ;;  %v4302_v32 = vadd.f32 %v2134_v55, %v1805_v4  ;;  %v1810_v57 = vadd.f32 %v3361_v30, %v4168_v40 }
 0x253   :  { %v1737_v13 = vpop.f32.mrf.mxu1 }
 0x254   :  { %v2147_v24 = vpop.f32.mrf.mxu0  ;;  %v4305_v29 = vadd.f32 %v3425_v35, %v1810_v57  ;;  %v1808_v0 = vadd.f32 %v1737_v13, %v4170_v53 }
 0x255   :  { %v3362_v58 = vpop.f32.mrf.mxu1 }
 0x256   :  { %v3426_v28 = vpop.f32.mrf.mxu0  ;;  %v4308_v22 = vadd.f32 %v2147_v24, %v1808_v0  ;;  %v1811_v52 = vadd.f32 %v3362_v58, %v4172_v54 }
 0x257   :  { %v1740_v23 = vpop.f32.mrf.mxu1 }
 0x258   :  { %v2150_v20 = vpop.f32.mrf.mxu0  ;;  %v4311_v38 = vadd.f32 %v3426_v28, %v1811_v52  ;;  %v1809_v55 = vadd.f32 %v1740_v23, %v4174_v7 }
 0x259   :  { %v3365_v4 = vpop.f32.mrf.mxu1 }
 0x25a   :  { %v3429_v40 = vpop.f32.mrf.mxu0  ;;  %v4314_v30 = vadd.f32 %v2150_v20, %v1809_v55  ;;  %v1814_v35 = vadd.f32 %v3365_v4, %v4176_v48  ;;  %v4329_v48 = vld [vmem:[%s4631_s5] ss:$0 sm:$0xff] }
 0x25b   :  { %v1753_v57 = vpop.f32.mrf.mxu1 }
 0x25c   :  { %v2163_v53 = vpop.f32.mrf.mxu0  ;;  %v4317_v13 = vadd.f32 %v3429_v40, %v1814_v35  ;;  %v1812_v24 = vadd.f32 %v1753_v57, %v4178_v36 }
 0x25d   :  { %v3366_v0 = vpop.f32.mrf.mxu1 }
 0x25e   :  { %v3430_v54 = vpop.f32.mrf.mxu0  ;;  %v4320_v58 = vadd.f32 %v2163_v53, %v1812_v24  ;;  %v1815_v28 = vadd.f32 %v3366_v0, %v4180_v61  ;;  %v4338_v61 = vld [vmem:[%s4632_s6] ss:$0 sm:$0xff] }
 0x25f   :  { %v1756_v52 = vpop.f32.mrf.mxu1 }
 0x260   :  { %v2166_v7 = vpop.f32.mrf.mxu0  ;;  %v4323_v23 = vadd.f32 %v3430_v54, %v1815_v28  ;;  %v1813_v20 = vadd.f32 %v1756_v52, %v4182_v19 }
 0x261   :  { %v3453_v4 = vpop.f32.mrf.mxu1 }
 0x262   :  { %v3449_v55 = vpop.f32.mrf.mxu0  ;;  %v4331_v36 = vadd.f32 %v2166_v7, %v1813_v20  ;;  %v2594_v35 = vadd.f32 %v3453_v4, %v4197_v45 }
 0x263   :  { %v2590_v40 = vadd.f32 %v3449_v55, %v4185_v10  ;;  %v2413_v19 = vpop.f32.mrf.mxu1 }
 0x264   :  { %4634 = vst [vmem:[#allocation6_spill] sm:$0xff] %v4331_v36  ;;  %v2397_v57 = vpop.f32.mrf.mxu0  ;;  %v2649_v24 = vmul.f32 %v4329_v48, %v2594_v35  ;;  %v2592_v54 = vadd.f32 %v2413_v19, %v4200_v34 }
 0x265   :  { %v2645_v53 = vmul.f32 %v4329_v48, %v2590_v40  ;;  %v2588_v0 = vadd.f32 %v2397_v57, %v4188_v47  ;;  %v3454_v52 = vpop.f32.mrf.mxu1 }
 0x266   :  { %v3450_v28 = vpop.f32.mrf.mxu0  ;;  %v2704_v45 = vadd.f32 %v4338_v61, %v2649_v24  ;;  %v2647_v20 = vmul.f32 %v4329_v48, %v2592_v54  ;;  %v2595_v4 = vadd.f32 %v3454_v52, %v4203_v42 }
 0x267   :  { %v2700_v10 = vadd.f32 %v4338_v61, %v2645_v53  ;;  %v2643_v7 = vmul.f32 %v4329_v48, %v2588_v0  ;;  %v2591_v55 = vadd.f32 %v3450_v28, %v4191_v51  ;;  %v2416_v35 = vpop.f32.mrf.mxu1 }
 0x268   :  { %v2400_v40 = vpop.f32.mrf.mxu0  ;;  %v2752_v47 = vmax.f32 %v2704_v45, 0.0  ;;  %v2702_v57 = vadd.f32 %v4338_v61, %v2647_v20  ;;  %v2650_v53 = vmul.f32 %v4329_v48, %v2595_v4  ;;  %v2593_v0 = vadd.f32 %v2416_v35, %v4206_v6 }
 0x269   :  { %v2748_v36 = vmax.f32 %v2700_v10, 0.0  ;;  %v2698_v34 = vadd.f32 %v4338_v61, %v2643_v7  ;;  %v2646_v19 = vmul.f32 %v4329_v48, %v2591_v55  ;;  %v2589_v24 = vadd.f32 %v2400_v40, %v4194_v31  ;;  %v3457_v54 = vpop.f32.mrf.mxu1 }
 0x26a   :  { %2800 = vst [vmem:[%s4633_s7 + $0x30] sm:$0x3f] %v2752_v47  ;;  %v2750_v42 = vmax.f32 %v2702_v57, 0.0  ;;  %v2598_v28 = vadd.f32 %v3457_v54, %v4209_v15  ;;  %v2705_v10 = vadd.f32 %v4338_v61, %v2650_v53  ;;  %v2648_v6 = vmul.f32 %v4329_v48, %v2593_v0 }
 0x26b   :  { %2796 = vst [vmem:[%s4633_s7 + $0x10] sm:$0x3f] %v2748_v36  ;;  %v2746_v51 = vmax.f32 %v2698_v34, 0.0  ;;  %v2701_v52 = vadd.f32 %v4338_v61, %v2646_v19  ;;  %v2644_v31 = vmul.f32 %v4329_v48, %v2589_v24  ;;  %v2429_v45 = vpop.f32.mrf.mxu1 }
 0x26c   :  { %2798 = vst [vmem:[%s4633_s7 + $0x20] sm:$0x3f] %v2750_v42  ;;  %v2653_v36 = vmul.f32 %v4329_v48, %v2598_v28  ;;  %v2596_v15 = vadd.f32 %v2429_v45, %v4212_v12  ;;  %v2753_v20 = vmax.f32 %v2705_v10, 0.0  ;;  %v2703_v4 = vadd.f32 %v4338_v61, %v2648_v6 }
 0x26d   :  { %2794 = vst [vmem:[%s4633_s7] sm:$0x3f] %v2746_v51  ;;  %v2749_v7 = vmax.f32 %v2701_v52, 0.0  ;;  %v2699_v55 = vadd.f32 %v4338_v61, %v2644_v31  ;;  %v3458_v40 = vpop.f32.mrf.mxu1 }
 0x26e   :  { %v2708_v35 = vadd.f32 %v4338_v61, %v2653_v36  ;;  %v2651_v47 = vmul.f32 %v4329_v48, %v2596_v15  ;;  %v2599_v34 = vadd.f32 %v3458_v40, %v4215_v16  ;;  %2801 = vst [vmem:[%s4633_s7 + $0x38] sm:$0x3f] %v2753_v20  ;;  %v2751_v57 = vmax.f32 %v2703_v4, 0.0 }
 0x26f   :  { %2797 = vst [vmem:[%s4633_s7 + $0x18] sm:$0x3f] %v2749_v7  ;;  %v2747_v12 = vmax.f32 %v2699_v55, 0.0  ;;  %v2432_v19 = vpop.f32.mrf.mxu1 }
 0x270   :  { %v2756_v53 = vmax.f32 %v2708_v35, 0.0  ;;  %v2706_v24 = vadd.f32 %v4338_v61, %v2651_v47  ;;  %v2654_v0 = vmul.f32 %v4329_v48, %v2599_v34  ;;  %v2597_v54 = vadd.f32 %v2432_v19, %v4218_v63  ;;  %2799 = vst [vmem:[%s4633_s7 + $0x28] sm:$0x3f] %v2751_v57 }
 0x271   :  { %2795 = vst [vmem:[%s4633_s7 + $0x8] sm:$0x3f] %v2747_v12  ;;  %v3461_v16 = vpop.f32.mrf.mxu1 }
 0x272   :  { %2804 = vst [vmem:[%s4633_s7 + $0x50] sm:$0x3f] %v2756_v53  ;;  %v2754_v51 = vmax.f32 %v2706_v24, 0.0  ;;  %v2709_v42 = vadd.f32 %v4338_v61, %v2654_v0  ;;  %v2652_v28 = vmul.f32 %v4329_v48, %v2597_v54  ;;  %v2602_v63 = vadd.f32 %v3461_v16, %v4221_v8 }
 0x273   :  { %v2445_v52 = vpop.f32.mrf.mxu1 }
 0x274   :  { %2802 = vst [vmem:[%s4633_s7 + $0x40] sm:$0x3f] %v2754_v51  ;;  %v2757_v10 = vmax.f32 %v2709_v42, 0.0  ;;  %v2707_v31 = vadd.f32 %v4338_v61, %v2652_v28  ;;  %v2657_v6 = vmul.f32 %v4329_v48, %v2602_v63  ;;  %v2600_v45 = vadd.f32 %v2445_v52, %v4224_v59 }
 0x275   :  { %v3462_v36 = vpop.f32.mrf.mxu1 }
 0x276   :  { %2805 = vst [vmem:[%s4633_s7 + $0x58] sm:$0x3f] %v2757_v10  ;;  %v2755_v15 = vmax.f32 %v2707_v31, 0.0  ;;  %v2712_v8 = vadd.f32 %v4338_v61, %v2657_v6  ;;  %v2655_v7 = vmul.f32 %v4329_v48, %v2600_v45  ;;  %v2603_v20 = vadd.f32 %v3462_v36, %v4227_v5 }
 0x277   :  { %v2448_v55 = vpop.f32.mrf.mxu1 }
 0x278   :  { %2803 = vst [vmem:[%s4633_s7 + $0x48] sm:$0x3f] %v2755_v15  ;;  %v2760_v4 = vmax.f32 %v2712_v8, 0.0  ;;  %v2710_v59 = vadd.f32 %v4338_v61, %v2655_v7  ;;  %v2658_v40 = vmul.f32 %v4329_v48, %v2603_v20  ;;  %v2601_v35 = vadd.f32 %v2448_v55, %v4230_v17 }
 0x279   :  { %v3465_v47 = vpop.f32.mrf.mxu1 }
 0x27a   :  { %2808 = vst [vmem:[%s4633_s7 + $0x70] sm:$0x3f] %v2760_v4  ;;  %v2758_v34 = vmax.f32 %v2710_v59, 0.0  ;;  %v2713_v5 = vadd.f32 %v4338_v61, %v2658_v40  ;;  %v2656_v12 = vmul.f32 %v4329_v48, %v2601_v35  ;;  %v2606_v57 = vadd.f32 %v3465_v47, %v4233_v41 }
 0x27b   :  { %v2461_v19 = vpop.f32.mrf.mxu1 }
 0x27c   :  { %2806 = vst [vmem:[%s4633_s7 + $0x60] sm:$0x3f] %v2758_v34  ;;  %v2761_v53 = vmax.f32 %v2713_v5, 0.0  ;;  %v2711_v17 = vadd.f32 %v4338_v61, %v2656_v12  ;;  %v2661_v24 = vmul.f32 %v4329_v48, %v2606_v57  ;;  %v2604_v0 = vadd.f32 %v2461_v19, %v4236_v60 }
 0x27d   :  { %v3466_v54 = vpop.f32.mrf.mxu1 }
 0x27e   :  { %2809 = vst [vmem:[%s4633_s7 + $0x78] sm:$0x3f] %v2761_v53  ;;  %v2759_v16 = vmax.f32 %v2711_v17, 0.0  ;;  %v2716_v41 = vadd.f32 %v4338_v61, %v2661_v24  ;;  %v2659_v51 = vmul.f32 %v4329_v48, %v2604_v0  ;;  %v2607_v42 = vadd.f32 %v3466_v54, %v4239_v18 }
 0x27f   :  { %v2464_v28 = vpop.f32.mrf.mxu1 }
 0x280   :  { %2807 = vst [vmem:[%s4633_s7 + $0x68] sm:$0x3f] %v2759_v16  ;;  %v2764_v63 = vmax.f32 %v2716_v41, 0.0  ;;  %v2714_v60 = vadd.f32 %v4338_v61, %v2659_v51  ;;  %v2662_v52 = vmul.f32 %v4329_v48, %v2607_v42  ;;  %v2605_v10 = vadd.f32 %v2464_v28, %v4242_v50 }
 0x281   :  { %v3469_v31 = vpop.f32.mrf.mxu1 }
 0x282   :  { %2812 = vst [vmem:[%s4633_s7 + $0x90] sm:$0x3f] %v2764_v63  ;;  %v2762_v6 = vmax.f32 %v2714_v60, 0.0  ;;  %v2717_v18 = vadd.f32 %v4338_v61, %v2662_v52  ;;  %v2660_v45 = vmul.f32 %v4329_v48, %v2605_v10  ;;  %v2610_v36 = vadd.f32 %v3469_v31, %v4245_v62 }
 0x283   :  { %v2477_v15 = vpop.f32.mrf.mxu1 }
 0x284   :  { %2810 = vst [vmem:[%s4633_s7 + $0x80] sm:$0x3f] %v2762_v6  ;;  %v2765_v8 = vmax.f32 %v2717_v18, 0.0  ;;  %v2715_v50 = vadd.f32 %v4338_v61, %v2660_v45  ;;  %v2665_v7 = vmul.f32 %v4329_v48, %v2610_v36  ;;  %v2608_v20 = vadd.f32 %v2477_v15, %v4248_v25 }
 0x285   :  { %v3470_v55 = vpop.f32.mrf.mxu1 }
 0x286   :  { %2813 = vst [vmem:[%s4633_s7 + $0x98] sm:$0x3f] %v2765_v8  ;;  %v2763_v4 = vmax.f32 %v2715_v50, 0.0  ;;  %v2720_v62 = vadd.f32 %v4338_v61, %v2665_v7  ;;  %v2663_v59 = vmul.f32 %v4329_v48, %v2608_v20  ;;  %v2611_v40 = vadd.f32 %v3470_v55, %v4251_v27 }
 0x287   :  { %v2480_v35 = vpop.f32.mrf.mxu1 }
 0x288   :  { %2811 = vst [vmem:[%s4633_s7 + $0x88] sm:$0x3f] %v2763_v4  ;;  %v2768_v47 = vmax.f32 %v2720_v62, 0.0  ;;  %v2718_v25 = vadd.f32 %v4338_v61, %v2663_v59  ;;  %v2666_v34 = vmul.f32 %v4329_v48, %v2611_v40  ;;  %v2609_v5 = vadd.f32 %v2480_v35, %v4254_v46 }
 0x289   :  { %v3473_v12 = vpop.f32.mrf.mxu1 }
 0x28a   :  { %2816 = vst [vmem:[%s4633_s7 + $0xb0] sm:$0x3f] %v2768_v47  ;;  %v2766_v57 = vmax.f32 %v2718_v25, 0.0  ;;  %v2721_v27 = vadd.f32 %v4338_v61, %v2666_v34  ;;  %v2664_v19 = vmul.f32 %v4329_v48, %v2609_v5  ;;  %v2614_v53 = vadd.f32 %v3473_v12, %v4257_v26 }
 0x28b   :  { %v2493_v17 = vpop.f32.mrf.mxu1 }
 0x28c   :  { %2814 = vst [vmem:[%s4633_s7 + $0xa0] sm:$0x3f] %v2766_v57  ;;  %v2769_v24 = vmax.f32 %v2721_v27, 0.0  ;;  %v2719_v46 = vadd.f32 %v4338_v61, %v2664_v19  ;;  %v2669_v0 = vmul.f32 %v4329_v48, %v2614_v53  ;;  %v2612_v54 = vadd.f32 %v2493_v17, %v4260_v11 }
 0x28d   :  { %v3474_v16 = vpop.f32.mrf.mxu1 }
 0x28e   :  { %2817 = vst [vmem:[%s4633_s7 + $0xb8] sm:$0x3f] %v2769_v24  ;;  %v2767_v41 = vmax.f32 %v2719_v46, 0.0  ;;  %v2724_v26 = vadd.f32 %v4338_v61, %v2669_v0  ;;  %v2667_v51 = vmul.f32 %v4329_v48, %v2612_v54  ;;  %v2615_v42 = vadd.f32 %v3474_v16, %v4263_v2 }
 0x28f   :  { %v2496_v28 = vpop.f32.mrf.mxu1 }
 0x290   :  { %2815 = vst [vmem:[%s4633_s7 + $0xa8] sm:$0x3f] %v2767_v41  ;;  %v2772_v63 = vmax.f32 %v2724_v26, 0.0  ;;  %v2722_v11 = vadd.f32 %v4338_v61, %v2667_v51  ;;  %v2670_v60 = vmul.f32 %v4329_v48, %v2615_v42  ;;  %v2613_v52 = vadd.f32 %v2496_v28, %v4266_v33 }
 0x291   :  { %v3477_v10 = vpop.f32.mrf.mxu1 }
 0x292   :  { %2820 = vst [vmem:[%s4633_s7 + $0xd0] sm:$0x3f] %v2772_v63  ;;  %v2770_v31 = vmax.f32 %v2722_v11, 0.0  ;;  %v2725_v2 = vadd.f32 %v4338_v61, %v2670_v60  ;;  %v2668_v6 = vmul.f32 %v4329_v48, %v2613_v52  ;;  %v2618_v18 = vadd.f32 %v3477_v10, %v4269_v56 }
 0x293   :  { %v2509_v45 = vpop.f32.mrf.mxu1 }
 0x294   :  { %2818 = vst [vmem:[%s4633_s7 + $0xc0] sm:$0x3f] %v2770_v31  ;;  %v2773_v36 = vmax.f32 %v2725_v2, 0.0  ;;  %v2723_v33 = vadd.f32 %v4338_v61, %v2668_v6  ;;  %v2673_v15 = vmul.f32 %v4329_v48, %v2618_v18  ;;  %v2616_v8 = vadd.f32 %v2509_v45, %v4272_v49 }
 0x295   :  { %v3478_v50 = vpop.f32.mrf.mxu1 }
 0x296   :  { %2821 = vst [vmem:[%s4633_s7 + $0xd8] sm:$0x3f] %v2773_v36  ;;  %v2771_v7 = vmax.f32 %v2723_v33, 0.0  ;;  %v2728_v56 = vadd.f32 %v4338_v61, %v2673_v15  ;;  %v2671_v20 = vmul.f32 %v4329_v48, %v2616_v8  ;;  %v2619_v55 = vadd.f32 %v3478_v50, %v4275_v9 }
 0x297   :  { %v2512_v4 = vpop.f32.mrf.mxu1 }
 0x298   :  { %2819 = vst [vmem:[%s4633_s7 + $0xc8] sm:$0x3f] %v2771_v7  ;;  %v2776_v62 = vmax.f32 %v2728_v56, 0.0  ;;  %v2726_v49 = vadd.f32 %v4338_v61, %v2671_v20  ;;  %v2674_v59 = vmul.f32 %v4329_v48, %v2619_v55  ;;  %v2617_v40 = vadd.f32 %v2512_v4, %v4278_v44 }
 0x299   :  { %v3481_v35 = vpop.f32.mrf.mxu1 }
 0x29a   :  { %2824 = vst [vmem:[%s4633_s7 + $0xf0] sm:$0x3f] %v2776_v62  ;;  %v2774_v47 = vmax.f32 %v2726_v49, 0.0  ;;  %v2729_v9 = vadd.f32 %v4338_v61, %v2674_v59  ;;  %v2672_v25 = vmul.f32 %v4329_v48, %v2617_v40  ;;  %v2622_v34 = vadd.f32 %v3481_v35, %v4281_v21 }
 0x29b   :  { %v2525_v5 = vpop.f32.mrf.mxu1 }
 0x29c   :  { %2822 = vst [vmem:[%s4633_s7 + $0xe0] sm:$0x3f] %v2774_v47  ;;  %v2777_v12 = vmax.f32 %v2729_v9, 0.0  ;;  %v2727_v44 = vadd.f32 %v4338_v61, %v2672_v25  ;;  %v2677_v57 = vmul.f32 %v4329_v48, %v2622_v34  ;;  %v2620_v27 = vadd.f32 %v2525_v5, %v4284_v37 }
 0x29d   :  { %v3482_v19 = vpop.f32.mrf.mxu1 }
 0x29e   :  { %2825 = vst [vmem:[%s4633_s7 + $0xf8] sm:$0x3f] %v2777_v12  ;;  %v2775_v53 = vmax.f32 %v2727_v44, 0.0  ;;  %v2732_v21 = vadd.f32 %v4338_v61, %v2677_v57  ;;  %v2675_v17 = vmul.f32 %v4329_v48, %v2620_v27  ;;  %v2623_v24 = vadd.f32 %v3482_v19, %v4287_v1 }
 0x29f   :  { %v2528_v46 = vpop.f32.mrf.mxu1 }
 0x2a0   :  { %2823 = vst [vmem:[%s4633_s7 + $0xe8] sm:$0x3f] %v2775_v53  ;;  %v2780_v0 = vmax.f32 %v2732_v21, 0.0  ;;  %v2730_v37 = vadd.f32 %v4338_v61, %v2675_v17  ;;  %v2678_v54 = vmul.f32 %v4329_v48, %v2623_v24  ;;  %v2621_v16 = vadd.f32 %v2528_v46, %v4290_v39 }
 0x2a1   :  { %v3485_v41 = vpop.f32.mrf.mxu1 }
 0x2a2   :  { %2828 = vst [vmem:[%s4633_s7 + $0x110] sm:$0x3f] %v2780_v0  ;;  %v2778_v26 = vmax.f32 %v2730_v37, 0.0  ;;  %v2733_v1 = vadd.f32 %v4338_v61, %v2678_v54  ;;  %v2676_v51 = vmul.f32 %v4329_v48, %v2621_v16  ;;  %v2626_v42 = vadd.f32 %v3485_v41, %v4293_v3  ;;  %v4635_v54 = vld [vmem:[#allocation6_spill] sm:$0xff] }
 0x2a3   :  { %v2541_v28 = vpop.f32.mrf.mxu1 }
 0x2a4   :  { %2826 = vst [vmem:[%s4633_s7 + $0x100] sm:$0x3f] %v2778_v26  ;;  %v2781_v63 = vmax.f32 %v2733_v1, 0.0  ;;  %v2731_v39 = vadd.f32 %v4338_v61, %v2676_v51  ;;  %v2681_v11 = vmul.f32 %v4329_v48, %v2626_v42  ;;  %v2624_v60 = vadd.f32 %v2541_v28, %v4296_v43 }
 0x2a5   :  { %v3486_v52 = vpop.f32.mrf.mxu1 }
 0x2a6   :  { %2829 = vst [vmem:[%s4633_s7 + $0x118] sm:$0x3f] %v2781_v63  ;;  %v2779_v10 = vmax.f32 %v2731_v39, 0.0  ;;  %v2736_v3 = vadd.f32 %v4338_v61, %v2681_v11  ;;  %v2679_v31 = vmul.f32 %v4329_v48, %v2624_v60  ;;  %v2627_v2 = vadd.f32 %v3486_v52, %v4299_v14 }
 0x2a7   :  { %v2544_v6 = vpop.f32.mrf.mxu1 }
 0x2a8   :  { %2827 = vst [vmem:[%s4633_s7 + $0x108] sm:$0x3f] %v2779_v10  ;;  %v2784_v18 = vmax.f32 %v2736_v3, 0.0  ;;  %v2734_v43 = vadd.f32 %v4338_v61, %v2679_v31  ;;  %v2682_v45 = vmul.f32 %v4329_v48, %v2627_v2  ;;  %v2625_v36 = vadd.f32 %v2544_v6, %v4302_v32 }
 0x2a9   :  { %v3489_v33 = vpop.f32.mrf.mxu1 }
 0x2aa   :  { %2832 = vst [vmem:[%s4633_s7 + $0x130] sm:$0x3f] %v2784_v18  ;;  %v2782_v15 = vmax.f32 %v2734_v43, 0.0  ;;  %v2737_v14 = vadd.f32 %v4338_v61, %v2682_v45  ;;  %v2680_v8 = vmul.f32 %v4329_v48, %v2625_v36  ;;  %v2630_v50 = vadd.f32 %v3489_v33, %v4305_v29 }
 0x2ab   :  { %v2557_v7 = vpop.f32.mrf.mxu1 }
 0x2ac   :  { %2830 = vst [vmem:[%s4633_s7 + $0x120] sm:$0x3f] %v2782_v15  ;;  %v2785_v56 = vmax.f32 %v2737_v14, 0.0  ;;  %v2735_v32 = vadd.f32 %v4338_v61, %v2680_v8  ;;  %v2685_v20 = vmul.f32 %v4329_v48, %v2630_v50  ;;  %v2628_v55 = vadd.f32 %v2557_v7, %v4308_v22 }
 0x2ad   :  { %v3490_v4 = vpop.f32.mrf.mxu1 }
 0x2ae   :  { %2833 = vst [vmem:[%s4633_s7 + $0x138] sm:$0x3f] %v2785_v56  ;;  %v2783_v62 = vmax.f32 %v2735_v32, 0.0  ;;  %v2740_v29 = vadd.f32 %v4338_v61, %v2685_v20  ;;  %v2683_v49 = vmul.f32 %v4329_v48, %v2628_v55  ;;  %v2631_v59 = vadd.f32 %v3490_v4, %v4311_v38 }
 0x2af   :  { %v2560_v40 = vpop.f32.mrf.mxu1 }
 0x2b0   :  { %2831 = vst [vmem:[%s4633_s7 + $0x128] sm:$0x3f] %v2783_v62  ;;  %v2788_v35 = vmax.f32 %v2740_v29, 0.0  ;;  %v2738_v22 = vadd.f32 %v4338_v61, %v2683_v49  ;;  %v2686_v47 = vmul.f32 %v4329_v48, %v2631_v59  ;;  %v2629_v9 = vadd.f32 %v2560_v40, %v4314_v30 }
 0x2b1   :  { %v3493_v25 = vpop.f32.mrf.mxu1 }
 0x2b2   :  { %2836 = vst [vmem:[%s4633_s7 + $0x150] sm:$0x3f] %v2788_v35  ;;  %v2786_v34 = vmax.f32 %v2738_v22, 0.0  ;;  %v2741_v38 = vadd.f32 %v4338_v61, %v2686_v47  ;;  %v2684_v5 = vmul.f32 %v4329_v48, %v2629_v9  ;;  %v2634_v12 = vadd.f32 %v3493_v25, %v4317_v13 }
 0x2b3   :  { %v2573_v44 = vpop.f32.mrf.mxu1 }
 0x2b4   :  { %2834 = vst [vmem:[%s4633_s7 + $0x140] sm:$0x3f] %v2786_v34  ;;  %v2789_v57 = vmax.f32 %v2741_v38, 0.0  ;;  %v2739_v30 = vadd.f32 %v4338_v61, %v2684_v5  ;;  %v2689_v27 = vmul.f32 %v4329_v48, %v2634_v12  ;;  %v2632_v19 = vadd.f32 %v2573_v44, %v4320_v58 }
 0x2b5   :  { %v3494_v53 = vpop.f32.mrf.mxu1 }
 0x2b6   :  { %2837 = vst [vmem:[%s4633_s7 + $0x158] sm:$0x3f] %v2789_v57  ;;  %v2787_v21 = vmax.f32 %v2739_v30, 0.0  ;;  %v2744_v13 = vadd.f32 %v4338_v61, %v2689_v27  ;;  %v2687_v17 = vmul.f32 %v4329_v48, %v2632_v19  ;;  %v2635_v24 = vadd.f32 %v3494_v53, %v4323_v23 }
 0x2b7   :  { %v2576_v46 = vpop.f32.mrf.mxu1 }
 0x2b8   :  { %2835 = vst [vmem:[%s4633_s7 + $0x148] sm:$0x3f] %v2787_v21  ;;  %v2792_v0 = vmax.f32 %v2744_v13, 0.0  ;;  %v2742_v58 = vadd.f32 %v4338_v61, %v2687_v17  ;;  %v2690_v37 = vmul.f32 %v4329_v48, %v2635_v24  ;;  %v2633_v16 = vadd.f32 %v2576_v46, %v4635_v54 }
 0x2ba   :  { %2840 = vst [vmem:[%s4633_s7 + $0x170] sm:$0x3f] %v2792_v0  ;;  %v2790_v41 = vmax.f32 %v2742_v58, 0.0  ;;  %v2745_v26 = vadd.f32 %v4338_v61, %v2690_v37  ;;  %v2688_v23 = vmul.f32 %v4329_v48, %v2633_v16 }
 0x2bc   :  { %2838 = vst [vmem:[%s4633_s7 + $0x160] sm:$0x3f] %v2790_v41  ;;  %v2793_v1 = vmax.f32 %v2745_v26, 0.0  ;;  %v2743_v51 = vadd.f32 %v4338_v61, %v2688_v23 }
 0x2be   :  { %2841 = vst [vmem:[%s4633_s7 + $0x178] sm:$0x3f] %v2793_v1  ;;  %v2791_v42 = vmax.f32 %v2743_v51, 0.0 }
 0x2c0   :  { %2839 = vst [vmem:[%s4633_s7 + $0x168] sm:$0x3f] %v2791_v42 }
 0x2c1   :  { %2846 = vsyncpa [#allocation4], 1 }

</bundles_post_ra>
